<compile_context>
chip_gen: v5e
topology: v5e:2x2
jax: 0.10.0
libtpu: 0.0.40
codegen_flags: <defaults>
</compile_context>

<pallas_src>
import functools

import jax
import jax.numpy as jnp
from jax.experimental import pallas as pl
from jax.experimental.pallas import tpu as pltpu


# ---------------------------------------------------------------------------
# Kernel 1: fused input projection for both directions (row-tiled, pipelined)
#   out = x @ [W_ih_f^T | W_ih_b^T] + [b_f | b_b]        (bias folded once)
# ---------------------------------------------------------------------------
def _in_proj_kernel(x_ref, w_ref, b_ref, o_ref):
    o_ref[...] = (jnp.dot(x_ref[...], w_ref[...],
                          preferred_element_type=jnp.float32)
                  + b_ref[...])


def _input_projection(x_flat, w_cat, b_cat, *, tile_m=512):
    """x_flat: (M, Din) bf16, w_cat: (Din, 8H) bf16, b_cat: (1, 8H) f32."""
    M, Din = x_flat.shape
    N = w_cat.shape[1]
    tm = min(tile_m, M)                    # M is a multiple of 8 (batch padded)
    return pl.pallas_call(
        _in_proj_kernel,
        grid=(pl.cdiv(M, tm),),
        in_specs=[
            pl.BlockSpec((tm, Din), lambda m: (m, 0)),
            pl.BlockSpec((Din, N), lambda m: (0, 0)),   # weights stay resident
            pl.BlockSpec((1, N), lambda m: (0, 0)),     # bias stays resident
        ],
        out_specs=pl.BlockSpec((tm, N), lambda m: (m, 0)),
        out_shape=jax.ShapeDtypeStruct((M, N), jnp.float32),
        compiler_params=pltpu.CompilerParams(
            dimension_semantics=("parallel",)),
    )(x_flat, w_cat, b_cat)


# ---------------------------------------------------------------------------
# Kernel 2: time-tiled bidirectional recurrence.
#   grid = (2 directions [parallel], n_time_tiles [arbitrary])
#   gx  : (T_pad, B, 8H) f32   -- precomputed gate inputs, fwd|bwd along last dim
#   out : (T_pad, B, 2H) f32   -- fwd|bwd hidden states along last dim (free concat)
# ---------------------------------------------------------------------------
def _bidir_recurrence(gx, w_hh, *, t_valid, tile_t):
    T_pad, B, H8 = gx.shape
    H = H8 // 8
    H4 = 4 * H
    TT = min(tile_t, T_pad)
    assert T_pad % TT == 0
    n_tt = T_pad // TT
    mask_tail = (t_valid != T_pad)         # static: only mask when time was padded

    def kernel(gx_ref, whh_ref, out_ref, hn_ref, cn_ref, h_sc, c_sc):
        d = pl.program_id(0)               # 0 = forward, 1 = backward
        tt = pl.program_id(1)

        @pl.when(tt == 0)
        def _():
            h_sc[...] = jnp.zeros_like(h_sc)
            c_sc[...] = jnp.zeros_like(c_sc)

        whh = whh_ref[...]                 # (H, 4H) bf16, VMEM-resident across tt

        def step(s, carry):
            h, c = carry
            # backward dir walks the tile in reverse (tile order also reversed in
            # the index_map) -> global reversed time order without jnp.flip.
            t_loc = s + d * (TT - 1 - 2 * s)
            gates = gx_ref[t_loc] + jnp.dot(h.astype(jnp.bfloat16), whh,
                                            preferred_element_type=jnp.float32)
            if_sig = jax.nn.sigmoid(gates[:, :2 * H])   # fused i,f sigmoid (one slab)
            i_g = if_sig[:, :H]
            f_g = if_sig[:, H:]
            g_g = jnp.tanh(gates[:, 2 * H:3 * H])
            o_g = jax.nn.sigmoid(gates[:, 3 * H:])
            c_new = f_g * c + i_g * g_g
            h_new = o_g * jnp.tanh(c_new)
            out_ref[t_loc] = h_new
            if mask_tail:                  # keep carry frozen on padded time steps
                lin = tt * TT + s
                t_glob = lin + d * (T_pad - 1 - 2 * lin)
                valid = t_glob < t_valid
                h_new = jnp.where(valid, h_new, h)
                c_new = jnp.where(valid, c_new, c)
            return h_new, c_new

        h_fin, c_fin = jax.lax.fori_loop(0, TT, step, (h_sc[...], c_sc[...]),
                                         unroll=min(TT, 4))
        h_sc[...] = h_fin
        c_sc[...] = c_fin

        @pl.when(tt == n_tt - 1)
        def _():
            hn_ref[...] = h_fin
            cn_ref[...] = c_fin

    # block index along time: tt for fwd, n_tt-1-tt for bwd (pure int arithmetic)
    def t_block(d, tt):
        return tt + d * (n_tt - 1 - 2 * tt)

    out, h_n, c_n = pl.pallas_call(
        kernel,
        grid=(2, n_tt),
        in_specs=[
            pl.BlockSpec((TT, B, H4), lambda d, tt: (t_block(d, tt), 0, d)),
            pl.BlockSpec((None, H, H4), lambda d, tt: (d, 0, 0)),
        ],
        out_specs=[
            pl.BlockSpec((TT, B, H), lambda d, tt: (t_block(d, tt), 0, d)),
            pl.BlockSpec((None, B, H), lambda d, tt: (d, 0, 0)),
            pl.BlockSpec((None, B, H), lambda d, tt: (d, 0, 0)),
        ],
        out_shape=[
            jax.ShapeDtypeStruct((T_pad, B, 2 * H), jnp.float32),
            jax.ShapeDtypeStruct((2, B, H), jnp.float32),
            jax.ShapeDtypeStruct((2, B, H), jnp.float32),
        ],
        scratch_shapes=[pltpu.VMEM((B, H), jnp.float32),
                        pltpu.VMEM((B, H), jnp.float32)],
        compiler_params=pltpu.CompilerParams(
            dimension_semantics=("parallel", "arbitrary")),
    )(gx, w_hh)
    return out, h_n, c_n


# ---------------------------------------------------------------------------
# Parameter prep (done once, outside the per-call graph).
# ---------------------------------------------------------------------------
def prep_pblstm_params(fwd, bwd):
    w_ih_f, w_hh_f, b_ih_f, b_hh_f = fwd
    w_ih_b, w_hh_b, b_ih_b, b_hh_b = bwd
    H4 = w_ih_f.shape[0]
    w_ih_cat = jnp.concatenate([w_ih_f.T, w_ih_b.T], axis=1).astype(jnp.bfloat16)
    b_cat = jnp.concatenate([b_ih_f + b_hh_f, b_ih_b + b_hh_b]
                            ).reshape(1, 2 * H4).astype(jnp.float32)
    w_hh = jnp.stack([w_hh_f.T, w_hh_b.T], axis=0).astype(jnp.bfloat16)
    return w_ih_cat, b_cat, w_hh


# ---------------------------------------------------------------------------
# pBLSTM forward (matches the PyTorch module, batch_first=True I/O).
# ---------------------------------------------------------------------------
def pblstm_forward(x_bld, params, *, time_tile=64, proj_tile_m=512):
    w_ih_cat, b_cat, w_hh = params
    B, L, D = x_bld.shape
    H = w_hh.shape[1]
    assert H % 128 == 0, "hidden_dim must be a multiple of 128 for this kernel"
    L2 = L - L % 2                     # odd trailing timestep dropped (matches spec)
    T = L2 // 2
    Din = 2 * D

    # Pyramidal reshape: pair adjacent timesteps.
    x = x_bld[:, :L2, :].reshape(B, T, Din)

    # Pad batch to a sublane multiple (>=8): fuller vregs, unmasked per-step stores.
    B_pad = max(8, -(-B // 8) * 8)
    if B_pad != B:
        x = jnp.pad(x, ((0, B_pad - B), (0, 0), (0, 0)))

    # Time-major so each recurrence step reads a contiguous (B, 4H) slab.
    x_tbd = jnp.transpose(x, (1, 0, 2)).astype(jnp.bfloat16)       # (T, B_pad, Din)

    # Hoisted input projection for both directions at once.
    gx = _input_projection(x_tbd.reshape(T * B_pad, Din), w_ih_cat, b_cat,
                           tile_m=proj_tile_m)
    gx = gx.reshape(T, B_pad, 8 * H)       # free reshape: [...,:4H]=fwd, [...,4H:]=bwd

    # Pad time to a multiple of the time tile (recurrence masks the carry on the tail).
    TT = min(time_tile, T)
    T_pad = -(-T // TT) * TT
    if T_pad != T:
        gx = jnp.pad(gx, ((0, T_pad - T), (0, 0), (0, 0)))

    out, h_n, c_n = _bidir_recurrence(gx, w_hh, t_valid=T, tile_t=TT)

    output = jnp.transpose(out[:T, :B, :], (1, 0, 2))               # (B, T, 2H)
    return output, (h_n[:, :B, :], c_n[:, :B, :])


# ---------------------------------------------------------------------------
# Init (nn.LSTM parameter shapes, U(-k, k)) and a pure-JAX f32 reference.
# ---------------------------------------------------------------------------
def init_pblstm_params(key, input_dim, hidden_dim):
    lstm_in = 2 * input_dim
    k = 1.0 / jnp.sqrt(jnp.float32(hidden_dim))
    keys = jax.random.split(key, 8)

    def u(kk, shape):
        return jax.random.uniform(kk, shape, jnp.float32, -k, k)

    fwd = (u(keys[0], (4 * hidden_dim, lstm_in)),
           u(keys[1], (4 * hidden_dim, hidden_dim)),
           u(keys[2], (4 * hidden_dim,)),
           u(keys[3], (4 * hidden_dim,)))
    bwd = (u(keys[4], (4 * hidden_dim, lstm_in)),
           u(keys[5], (4 * hidden_dim, hidden_dim)),
           u(keys[6], (4 * hidden_dim,)),
           u(keys[7], (4 * hidden_dim,)))
    return fwd, bwd


def _ref_lstm_dir(x_tbd, w_ih, w_hh, b_ih, b_hh):
    T, B, _ = x_tbd.shape
    H = w_hh.shape[1]

    def step(carry, x_t):
        h, c = carry
        gates = x_t @ w_ih.T + h @ w_hh.T + b_ih + b_hh
        i, f, g, o = jnp.split(gates, 4, axis=-1)
        c = jax.nn.sigmoid(f) * c + jax.nn.sigmoid(i) * jnp.tanh(g)
        h = jax.nn.sigmoid(o) * jnp.tanh(c)
        return (h, c), h

    init = (jnp.zeros((B, H), jnp.float32), jnp.zeros((B, H), jnp.float32))
    (h_n, c_n), out = jax.lax.scan(step, init, x_tbd)
    return out, h_n, c_n


def _ref_pblstm(x_bld, fwd, bwd):
    B, L, D = x_bld.shape
    L2 = L - L % 2
    x = x_bld[:, :L2, :].reshape(B, L2 // 2, 2 * D)
    x_tbd = jnp.transpose(x, (1, 0, 2))
    of, hf, cf = _ref_lstm_dir(x_tbd, *fwd)
    ob, hb, cb = _ref_lstm_dir(jnp.flip(x_tbd, 0), *bwd)
    ob = jnp.flip(ob, 0)
    out = jnp.transpose(jnp.concatenate([of, ob], -1), (1, 0, 2))
    return out, (jnp.stack([hf, hb]), jnp.stack([cf, cb]))


if __name__ == "__main__":
    key = jax.random.PRNGKey(0)
    kx, kp = jax.random.split(key)

    batch, seq, input_dim, hidden = 2, 8, 64, 128   # lane-aligned small shapes
    x = jax.random.normal(kx, (batch, seq, input_dim), jnp.float32)

    fwd_raw, bwd_raw = init_pblstm_params(kp, input_dim, hidden)
    params = prep_pblstm_params(fwd_raw, bwd_raw)

    run = jax.jit(functools.partial(pblstm_forward))
    out, (h_n, c_n) = run(x, params)
    jax.block_until_ready((out, h_n, c_n))

    assert out.shape == (batch, seq // 2, 2 * hidden), out.shape
    assert h_n.shape == (2, batch, hidden), h_n.shape
    assert c_n.shape == (2, batch, hidden), c_n.shape
    assert bool(jnp.all(jnp.isfinite(out)))

    # Loose-tolerance check vs. f32 pure-JAX reference (bf16 weights => small drift).
    ref_out, (ref_h, ref_c) = _ref_pblstm(x, fwd_raw, bwd_raw)
    assert float(jnp.max(jnp.abs(out - ref_out))) < 5e-2
    assert float(jnp.max(jnp.abs(h_n - ref_h))) < 5e-2
    assert float(jnp.max(jnp.abs(c_n - ref_c))) < 5e-2

    print("KERNEL_OK")
</pallas_src>

<mosaic_0001>
module attributes {stable_mosaic.version = 11 : i64} {
  func.func @_in_proj_kernel(%arg0: i32, %arg1: memref<32x128xbf16, #tpu.memory_space<vmem>>, %arg2: memref<128x1024xbf16, #tpu.memory_space<vmem>>, %arg3: memref<1x1024xf32, #tpu.memory_space<vmem>>, %arg4: memref<32x1024xf32, #tpu.memory_space<vmem>>) attributes {dimension_semantics = [#tpu.dimension_semantics<parallel>], iteration_bounds = array<i64: 1>, scalar_prefetch = 0 : i64, scratch_operands = 0 : i64, tpu.core_type = #tpu.core_type<tc>, window_params = [{transform_indices = @transform_0, window_bounds = array<i64: 32, 128>}, {pipeline_mode = #tpu.pipeline_mode<synchronous>, transform_indices = @transform_1, window_bounds = array<i64: 128, 1024>}, {pipeline_mode = #tpu.pipeline_mode<synchronous>, transform_indices = @transform_2, window_bounds = array<i64: 1, 1024>}, {transform_indices = @transform_3, window_bounds = array<i64: 32, 1024>}]} {
    %c0 = arith.constant 0 : index
    %c0_0 = arith.constant 0 : index
    %0 = vector.load %arg1[%c0, %c0_0] : memref<32x128xbf16, #tpu.memory_space<vmem>>, vector<32x128xbf16>
    %c0_1 = arith.constant 0 : index
    %c0_2 = arith.constant 0 : index
    %1 = vector.load %arg2[%c0_1, %c0_2] : memref<128x1024xbf16, #tpu.memory_space<vmem>>, vector<128x1024xbf16>
    %cst = arith.constant dense<0.000000e+00> : vector<32x1024xf32>
    %2 = tpu.matmul %0, %1, %cst {dimension_numbers = #tpu.dot_dimension_numbers<[1], [0], [0], [1], [0, 0, 1, 1], [], []>} : vector<32x128xbf16>, vector<128x1024xbf16>, vector<32x1024xf32> -> vector<32x1024xf32>
    %c0_3 = arith.constant 0 : index
    %c0_4 = arith.constant 0 : index
    %3 = vector.load %arg3[%c0_3, %c0_4] : memref<1x1024xf32, #tpu.memory_space<vmem>>, vector<1x1024xf32>
    %4 = vector.broadcast %3 : vector<1x1024xf32> to vector<32x1024xf32>
    %5 = arith.addf %2, %4 : vector<32x1024xf32>
    %c0_5 = arith.constant 0 : index
    %c0_6 = arith.constant 0 : index
    %6 = vector.load %arg4[%c0_5, %c0_6] : memref<32x1024xf32, #tpu.memory_space<vmem>>, vector<32x1024xf32>
    tpu.vector_store %arg4[%c0_5, %c0_6], %5 {strides = array<i32>} : memref<32x1024xf32, #tpu.memory_space<vmem>>, vector<32x1024xf32>,
    return
  }
  func.func @transform_0(%arg0: i32) -> (i32, i32) {
    %c0_i32 = arith.constant 0 : i32
    %c0_i32_0 = arith.constant 0 : i32
    return %arg0, %c0_i32 : i32, i32
  }
  func.func @transform_1(%arg0: i32) -> (i32, i32) {
    %c0_i32 = arith.constant 0 : i32
    %c0_i32_0 = arith.constant 0 : i32
    %c0_i32_1 = arith.constant 0 : i32
    return %c0_i32, %c0_i32_0 : i32, i32
  }
  func.func @transform_2(%arg0: i32) -> (i32, i32) {
    %c0_i32 = arith.constant 0 : i32
    %c0_i32_0 = arith.constant 0 : i32
    %c0_i32_1 = arith.constant 0 : i32
    return %c0_i32, %c0_i32_0 : i32, i32
  }
  func.func @transform_3(%arg0: i32) -> (i32, i32) {
    %c0_i32 = arith.constant 0 : i32
    %c0_i32_0 = arith.constant 0 : i32
    return %arg0, %c0_i32 : i32, i32
  }
}

module attributes {stable_mosaic.version = 11 : i64} {
  func.func @kernel(%arg0: i32, %arg1: i32, %arg2: memref<4x8x512xf32, #tpu.memory_space<vmem>>, %arg3: memref<1x128x512xbf16, #tpu.memory_space<vmem>>, %arg4: memref<4x8x128xf32, #tpu.memory_space<vmem>>, %arg5: memref<1x8x128xf32, #tpu.memory_space<vmem>>, %arg6: memref<1x8x128xf32, #tpu.memory_space<vmem>>, %arg7: memref<8x128xf32, #tpu.memory_space<vmem>>, %arg8: memref<8x128xf32, #tpu.memory_space<vmem>>) attributes {dimension_semantics = [#tpu.dimension_semantics<parallel>, #tpu.dimension_semantics<arbitrary>], iteration_bounds = array<i64: 2, 1>, scalar_prefetch = 0 : i64, scratch_operands = 2 : i64, tpu.core_type = #tpu.core_type<tc>, window_params = [{transform_indices = @transform_0, window_bounds = array<i64: 4, 8, 512>}, {transform_indices = @transform_1, window_bounds = array<i64: 1, 128, 512>}, {transform_indices = @transform_2, window_bounds = array<i64: 4, 8, 128>}, {transform_indices = @transform_3, window_bounds = array<i64: 1, 8, 128>}, {transform_indices = @transform_4, window_bounds = array<i64: 1, 8, 128>}]} {
    %c0_i32 = arith.constant 0 : i32
    %0 = arith.cmpi eq, %arg1, %c0_i32 : i32
    %1 = arith.extui %0 : i1 to i32
    %c0_i32_0 = arith.constant 0 : i32
    %2 = arith.cmpi ne, %1, %c0_i32_0 : i32
    scf.if %2 {
      %cst_49 = arith.constant 0.000000e+00 : f32
      %152 = vector.broadcast %cst_49 : f32 to vector<8x128xf32>
      %c0_50 = arith.constant 0 : index
      %c0_51 = arith.constant 0 : index
      %153 = vector.load %arg7[%c0_50, %c0_51] : memref<8x128xf32, #tpu.memory_space<vmem>>, vector<8x128xf32>
      tpu.vector_store %arg7[%c0_50, %c0_51], %152 {strides = array<i32>} : memref<8x128xf32, #tpu.memory_space<vmem>>, vector<8x128xf32>,
      %cst_52 = arith.constant 0.000000e+00 : f32
      %154 = vector.broadcast %cst_52 : f32 to vector<8x128xf32>
      %c0_53 = arith.constant 0 : index
      %c0_54 = arith.constant 0 : index
      %155 = vector.load %arg8[%c0_53, %c0_54] : memref<8x128xf32, #tpu.memory_space<vmem>>, vector<8x128xf32>
      tpu.vector_store %arg8[%c0_53, %c0_54], %154 {strides = array<i32>} : memref<8x128xf32, #tpu.memory_space<vmem>>, vector<8x128xf32>,
    } else {
    }
    %c0 = arith.constant 0 : index
    %c0_1 = arith.constant 0 : index
    %c0_2 = arith.constant 0 : index
    %3 = vector.load %arg3[%c0, %c0_1, %c0_2] : memref<1x128x512xbf16, #tpu.memory_space<vmem>>, vector<1x128x512xbf16>
    %4 = vector.shape_cast %3 : vector<1x128x512xbf16> to vector<128x512xbf16>
    %c0_3 = arith.constant 0 : index
    %c0_4 = arith.constant 0 : index
    %5 = vector.load %arg7[%c0_3, %c0_4] : memref<8x128xf32, #tpu.memory_space<vmem>>, vector<8x128xf32>
    %c0_5 = arith.constant 0 : index
    %c0_6 = arith.constant 0 : index
    %6 = vector.load %arg8[%c0_5, %c0_6] : memref<8x128xf32, #tpu.memory_space<vmem>>, vector<8x128xf32>
    %c0_i32_7 = arith.constant 0 : i32
    %c2_i32 = arith.constant 2 : i32
    %7 = arith.muli %c2_i32, %c0_i32_7 : i32
    %c3_i32 = arith.constant 3 : i32
    %8 = arith.subi %c3_i32, %7 : i32
    %9 = arith.muli %arg0, %8 : i32
    %10 = arith.addi %c0_i32_7, %9 : i32
    %11 = arith.index_cast %10 : i32 to index
    %c0_8 = arith.constant 0 : index
    %c0_9 = arith.constant 0 : index
    %12 = vector.load %arg2[%11, %c0_8, %c0_9] : memref<4x8x512xf32, #tpu.memory_space<vmem>>, vector<1x8x512xf32>
    %13 = vector.shape_cast %12 : vector<1x8x512xf32> to vector<8x512xf32>
    %14 = arith.truncf %5 : vector<8x128xf32> to vector<8x128xbf16>
    %cst = arith.constant dense<0.000000e+00> : vector<8x512xf32>
    %15 = tpu.matmul %14, %4, %cst {dimension_numbers = #tpu.dot_dimension_numbers<[1], [0], [0], [1], [0, 0, 1, 1], [], []>} : vector<8x128xbf16>, vector<128x512xbf16>, vector<8x512xf32> -> vector<8x512xf32>
    %16 = arith.addf %13, %15 : vector<8x512xf32>
    %17 = vector.extract_strided_slice %16 {offsets = [0, 0], sizes = [8, 256], strides = [1, 1]} : vector<8x512xf32> to vector<8x256xf32>
    %18 = arith.negf %17 : vector<8x256xf32>
    %19 = math.exp %18 : vector<8x256xf32>
    %cst_10 = arith.constant 1.000000e+00 : f32
    %20 = vector.broadcast %cst_10 : f32 to vector<8x256xf32>
    %21 = arith.addf %20, %19 : vector<8x256xf32>
    %22 = arith.divf %20, %21 : vector<8x256xf32>
    %23 = vector.extract_strided_slice %22 {offsets = [0, 0], sizes = [8, 128], strides = [1, 1]} : vector<8x256xf32> to vector<8x128xf32>
    %24 = vector.extract_strided_slice %22 {offsets = [0, 128], sizes = [8, 128], strides = [1, 1]} : vector<8x256xf32> to vector<8x128xf32>
    %25 = vector.extract_strided_slice %16 {offsets = [0, 256], sizes = [8, 128], strides = [1, 1]} : vector<8x512xf32> to vector<8x128xf32>
    %26 = math.tanh %25 : vector<8x128xf32>
    %27 = vector.extract_strided_slice %16 {offsets = [0, 384], sizes = [8, 128], strides = [1, 1]} : vector<8x512xf32> to vector<8x128xf32>
    %28 = arith.negf %27 : vector<8x128xf32>
    %29 = math.exp %28 : vector<8x128xf32>
    %cst_11 = arith.constant 1.000000e+00 : f32
    %30 = vector.broadcast %cst_11 : f32 to vector<8x128xf32>
    %31 = arith.addf %30, %29 : vector<8x128xf32>
    %32 = arith.divf %30, %31 : vector<8x128xf32>
    %33 = arith.mulf %24, %6 : vector<8x128xf32>
    %34 = arith.mulf %23, %26 : vector<8x128xf32>
    %35 = arith.addf %33, %34 : vector<8x128xf32>
    %36 = math.tanh %35 : vector<8x128xf32>
    %37 = arith.mulf %32, %36 : vector<8x128xf32>
    %38 = arith.index_cast %10 : i32 to index
    %c0_12 = arith.constant 0 : index
    %c0_13 = arith.constant 0 : index
    %39 = vector.load %arg4[%38, %c0_12, %c0_13] : memref<4x8x128xf32, #tpu.memory_space<vmem>>, vector<1x8x128xf32>
    %40 = vector.shape_cast %39 : vector<1x8x128xf32> to vector<8x128xf32>
    %41 = vector.shape_cast %37 : vector<8x128xf32> to vector<1x8x128xf32>
    tpu.vector_store %arg4[%38, %c0_12, %c0_13], %41 {strides = array<i32>} : memref<4x8x128xf32, #tpu.memory_space<vmem>>, vector<1x8x128xf32>,
    %c1_i32 = arith.constant 1 : i32
    %c2_i32_14 = arith.constant 2 : i32
    %42 = arith.muli %c2_i32_14, %c1_i32 : i32
    %c3_i32_15 = arith.constant 3 : i32
    %43 = arith.subi %c3_i32_15, %42 : i32
    %44 = arith.muli %arg0, %43 : i32
    %45 = arith.addi %c1_i32, %44 : i32
    %46 = arith.index_cast %45 : i32 to index
    %c0_16 = arith.constant 0 : index
    %c0_17 = arith.constant 0 : index
    %47 = vector.load %arg2[%46, %c0_16, %c0_17] : memref<4x8x512xf32, #tpu.memory_space<vmem>>, vector<1x8x512xf32>
    %48 = vector.shape_cast %47 : vector<1x8x512xf32> to vector<8x512xf32>
    %49 = arith.truncf %37 : vector<8x128xf32> to vector<8x128xbf16>
    %cst_18 = arith.constant dense<0.000000e+00> : vector<8x512xf32>
    %50 = tpu.matmul %49, %4, %cst_18 {dimension_numbers = #tpu.dot_dimension_numbers<[1], [0], [0], [1], [0, 0, 1, 1], [], []>} : vector<8x128xbf16>, vector<128x512xbf16>, vector<8x512xf32> -> vector<8x512xf32>
    %51 = arith.addf %48, %50 : vector<8x512xf32>
    %52 = vector.extract_strided_slice %51 {offsets = [0, 0], sizes = [8, 256], strides = [1, 1]} : vector<8x512xf32> to vector<8x256xf32>
    %53 = arith.negf %52 : vector<8x256xf32>
    %54 = math.exp %53 : vector<8x256xf32>
    %cst_19 = arith.constant 1.000000e+00 : f32
    %55 = vector.broadcast %cst_19 : f32 to vector<8x256xf32>
    %56 = arith.addf %55, %54 : vector<8x256xf32>
    %57 = arith.divf %55, %56 : vector<8x256xf32>
    %58 = vector.extract_strided_slice %57 {offsets = [0, 0], sizes = [8, 128], strides = [1, 1]} : vector<8x256xf32> to vector<8x128xf32>
    %59 = vector.extract_strided_slice %57 {offsets = [0, 128], sizes = [8, 128], strides = [1, 1]} : vector<8x256xf32> to vector<8x128xf32>
    %60 = vector.extract_strided_slice %51 {offsets = [0, 256], sizes = [8, 128], strides = [1, 1]} : vector<8x512xf32> to vector<8x128xf32>
    %61 = math.tanh %60 : vector<8x128xf32>
    %62 = vector.extract_strided_slice %51 {offsets = [0, 384], sizes = [8, 128], strides = [1, 1]} : vector<8x512xf32> to vector<8x128xf32>
    %63 = arith.negf %62 : vector<8x128xf32>
    %64 = math.exp %63 : vector<8x128xf32>
    %cst_20 = arith.constant 1.000000e+00 : f32
    %65 = vector.broadcast %cst_20 : f32 to vector<8x128xf32>
    %66 = arith.addf %65, %64 : vector<8x128xf32>
    %67 = arith.divf %65, %66 : vector<8x128xf32>
    %68 = arith.mulf %59, %35 : vector<8x128xf32>
    %69 = arith.mulf %58, %61 : vector<8x128xf32>
    %70 = arith.addf %68, %69 : vector<8x128xf32>
    %71 = math.tanh %70 : vector<8x128xf32>
    %72 = arith.mulf %67, %71 : vector<8x128xf32>
    %73 = arith.index_cast %45 : i32 to index
    %c0_21 = arith.constant 0 : index
    %c0_22 = arith.constant 0 : index
    %74 = vector.load %arg4[%73, %c0_21, %c0_22] : memref<4x8x128xf32, #tpu.memory_space<vmem>>, vector<1x8x128xf32>
    %75 = vector.shape_cast %74 : vector<1x8x128xf32> to vector<8x128xf32>
    %76 = vector.shape_cast %72 : vector<8x128xf32> to vector<1x8x128xf32>
    tpu.vector_store %arg4[%73, %c0_21, %c0_22], %76 {strides = array<i32>} : memref<4x8x128xf32, #tpu.memory_space<vmem>>, vector<1x8x128xf32>,
    %c2_i32_23 = arith.constant 2 : i32
    %c2_i32_24 = arith.constant 2 : i32
    %77 = arith.muli %c2_i32_24, %c2_i32_23 : i32
    %c3_i32_25 = arith.constant 3 : i32
    %78 = arith.subi %c3_i32_25, %77 : i32
    %79 = arith.muli %arg0, %78 : i32
    %80 = arith.addi %c2_i32_23, %79 : i32
    %81 = arith.index_cast %80 : i32 to index
    %c0_26 = arith.constant 0 : index
    %c0_27 = arith.constant 0 : index
    %82 = vector.load %arg2[%81, %c0_26, %c0_27] : memref<4x8x512xf32, #tpu.memory_space<vmem>>, vector<1x8x512xf32>
    %83 = vector.shape_cast %82 : vector<1x8x512xf32> to vector<8x512xf32>
    %84 = arith.truncf %72 : vector<8x128xf32> to vector<8x128xbf16>
    %cst_28 = arith.constant dense<0.000000e+00> : vector<8x512xf32>
    %85 = tpu.matmul %84, %4, %cst_28 {dimension_numbers = #tpu.dot_dimension_numbers<[1], [0], [0], [1], [0, 0, 1, 1], [], []>} : vector<8x128xbf16>, vector<128x512xbf16>, vector<8x512xf32> -> vector<8x512xf32>
    %86 = arith.addf %83, %85 : vector<8x512xf32>
    %87 = vector.extract_strided_slice %86 {offsets = [0, 0], sizes = [8, 256], strides = [1, 1]} : vector<8x512xf32> to vector<8x256xf32>
    %88 = arith.negf %87 : vector<8x256xf32>
    %89 = math.exp %88 : vector<8x256xf32>
    %cst_29 = arith.constant 1.000000e+00 : f32
    %90 = vector.broadcast %cst_29 : f32 to vector<8x256xf32>
    %91 = arith.addf %90, %89 : vector<8x256xf32>
    %92 = arith.divf %90, %91 : vector<8x256xf32>
    %93 = vector.extract_strided_slice %92 {offsets = [0, 0], sizes = [8, 128], strides = [1, 1]} : vector<8x256xf32> to vector<8x128xf32>
    %94 = vector.extract_strided_slice %92 {offsets = [0, 128], sizes = [8, 128], strides = [1, 1]} : vector<8x256xf32> to vector<8x128xf32>
    %95 = vector.extract_strided_slice %86 {offsets = [0, 256], sizes = [8, 128], strides = [1, 1]} : vector<8x512xf32> to vector<8x128xf32>
    %96 = math.tanh %95 : vector<8x128xf32>
    %97 = vector.extract_strided_slice %86 {offsets = [0, 384], sizes = [8, 128], strides = [1, 1]} : vector<8x512xf32> to vector<8x128xf32>
    %98 = arith.negf %97 : vector<8x128xf32>
    %99 = math.exp %98 : vector<8x128xf32>
    %cst_30 = arith.constant 1.000000e+00 : f32
    %100 = vector.broadcast %cst_30 : f32 to vector<8x128xf32>
    %101 = arith.addf %100, %99 : vector<8x128xf32>
    %102 = arith.divf %100, %101 : vector<8x128xf32>
    %103 = arith.mulf %94, %70 : vector<8x128xf32>
    %104 = arith.mulf %93, %96 : vector<8x128xf32>
    %105 = arith.addf %103, %104 : vector<8x128xf32>
    %106 = math.tanh %105 : vector<8x128xf32>
    %107 = arith.mulf %102, %106 : vector<8x128xf32>
    %108 = arith.index_cast %80 : i32 to index
    %c0_31 = arith.constant 0 : index
    %c0_32 = arith.constant 0 : index
    %109 = vector.load %arg4[%108, %c0_31, %c0_32] : memref<4x8x128xf32, #tpu.memory_space<vmem>>, vector<1x8x128xf32>
    %110 = vector.shape_cast %109 : vector<1x8x128xf32> to vector<8x128xf32>
    %111 = vector.shape_cast %107 : vector<8x128xf32> to vector<1x8x128xf32>
    tpu.vector_store %arg4[%108, %c0_31, %c0_32], %111 {strides = array<i32>} : memref<4x8x128xf32, #tpu.memory_space<vmem>>, vector<1x8x128xf32>,
    %c3_i32_33 = arith.constant 3 : i32
    %c2_i32_34 = arith.constant 2 : i32
    %112 = arith.muli %c2_i32_34, %c3_i32_33 : i32
    %c3_i32_35 = arith.constant 3 : i32
    %113 = arith.subi %c3_i32_35, %112 : i32
    %114 = arith.muli %arg0, %113 : i32
    %115 = arith.addi %c3_i32_33, %114 : i32
    %116 = arith.index_cast %115 : i32 to index
    %c0_36 = arith.constant 0 : index
    %c0_37 = arith.constant 0 : index
    %117 = vector.load %arg2[%116, %c0_36, %c0_37] : memref<4x8x512xf32, #tpu.memory_space<vmem>>, vector<1x8x512xf32>
    %118 = vector.shape_cast %117 : vector<1x8x512xf32> to vector<8x512xf32>
    %119 = arith.truncf %107 : vector<8x128xf32> to vector<8x128xbf16>
    %cst_38 = arith.constant dense<0.000000e+00> : vector<8x512xf32>
    %120 = tpu.matmul %119, %4, %cst_38 {dimension_numbers = #tpu.dot_dimension_numbers<[1], [0], [0], [1], [0, 0, 1, 1], [], []>} : vector<8x128xbf16>, vector<128x512xbf16>, vector<8x512xf32> -> vector<8x512xf32>
    %121 = arith.addf %118, %120 : vector<8x512xf32>
    %122 = vector.extract_strided_slice %121 {offsets = [0, 0], sizes = [8, 256], strides = [1, 1]} : vector<8x512xf32> to vector<8x256xf32>
    %123 = arith.negf %122 : vector<8x256xf32>
    %124 = math.exp %123 : vector<8x256xf32>
    %cst_39 = arith.constant 1.000000e+00 : f32
    %125 = vector.broadcast %cst_39 : f32 to vector<8x256xf32>
    %126 = arith.addf %125, %124 : vector<8x256xf32>
    %127 = arith.divf %125, %126 : vector<8x256xf32>
    %128 = vector.extract_strided_slice %127 {offsets = [0, 0], sizes = [8, 128], strides = [1, 1]} : vector<8x256xf32> to vector<8x128xf32>
    %129 = vector.extract_strided_slice %127 {offsets = [0, 128], sizes = [8, 128], strides = [1, 1]} : vector<8x256xf32> to vector<8x128xf32>
    %130 = vector.extract_strided_slice %121 {offsets = [0, 256], sizes = [8, 128], strides = [1, 1]} : vector<8x512xf32> to vector<8x128xf32>
    %131 = math.tanh %130 : vector<8x128xf32>
    %132 = vector.extract_strided_slice %121 {offsets = [0, 384], sizes = [8, 128], strides = [1, 1]} : vector<8x512xf32> to vector<8x128xf32>
    %133 = arith.negf %132 : vector<8x128xf32>
    %134 = math.exp %133 : vector<8x128xf32>
    %cst_40 = arith.constant 1.000000e+00 : f32
    %135 = vector.broadcast %cst_40 : f32 to vector<8x128xf32>
    %136 = arith.addf %135, %134 : vector<8x128xf32>
    %137 = arith.divf %135, %136 : vector<8x128xf32>
    %138 = arith.mulf %129, %105 : vector<8x128xf32>
    %139 = arith.mulf %128, %131 : vector<8x128xf32>
    %140 = arith.addf %138, %139 : vector<8x128xf32>
    %141 = math.tanh %140 : vector<8x128xf32>
    %142 = arith.mulf %137, %141 : vector<8x128xf32>
    %143 = arith.index_cast %115 : i32 to index
    %c0_41 = arith.constant 0 : index
    %c0_42 = arith.constant 0 : index
    %144 = vector.load %arg4[%143, %c0_41, %c0_42] : memref<4x8x128xf32, #tpu.memory_space<vmem>>, vector<1x8x128xf32>
    %145 = vector.shape_cast %144 : vector<1x8x128xf32> to vector<8x128xf32>
    %146 = vector.shape_cast %142 : vector<8x128xf32> to vector<1x8x128xf32>
    tpu.vector_store %arg4[%143, %c0_41, %c0_42], %146 {strides = array<i32>} : memref<4x8x128xf32, #tpu.memory_space<vmem>>, vector<1x8x128xf32>,
    %c4_i32 = arith.constant 4 : i32
    %c0_43 = arith.constant 0 : index
    %c0_44 = arith.constant 0 : index
    %147 = vector.load %arg7[%c0_43, %c0_44] : memref<8x128xf32, #tpu.memory_space<vmem>>, vector<8x128xf32>
    tpu.vector_store %arg7[%c0_43, %c0_44], %142 {strides = array<i32>} : memref<8x128xf32, #tpu.memory_space<vmem>>, vector<8x128xf32>,
    %c0_45 = arith.constant 0 : index
    %c0_46 = arith.constant 0 : index
    %148 = vector.load %arg8[%c0_45, %c0_46] : memref<8x128xf32, #tpu.memory_space<vmem>>, vector<8x128xf32>
    tpu.vector_store %arg8[%c0_45, %c0_46], %140 {strides = array<i32>} : memref<8x128xf32, #tpu.memory_space<vmem>>, vector<8x128xf32>,
    %c0_i32_47 = arith.constant 0 : i32
    %149 = arith.cmpi eq, %arg1, %c0_i32_47 : i32
    %150 = arith.extui %149 : i1 to i32
    %c0_i32_48 = arith.constant 0 : i32
    %151 = arith.cmpi ne, %150, %c0_i32_48 : i32
    scf.if %151 {
      %c0_49 = arith.constant 0 : index
      %c0_50 = arith.constant 0 : index
      %c0_51 = arith.constant 0 : index
      %152 = vector.load %arg5[%c0_49, %c0_50, %c0_51] : memref<1x8x128xf32, #tpu.memory_space<vmem>>, vector<1x8x128xf32>
      %153 = vector.shape_cast %152 : vector<1x8x128xf32> to vector<8x128xf32>
      %154 = vector.shape_cast %142 : vector<8x128xf32> to vector<1x8x128xf32>
      tpu.vector_store %arg5[%c0_49, %c0_50, %c0_51], %154 {strides = array<i32>} : memref<1x8x128xf32, #tpu.memory_space<vmem>>, vector<1x8x128xf32>,
      %c0_52 = arith.constant 0 : index
      %c0_53 = arith.constant 0 : index
      %c0_54 = arith.constant 0 : index
      %155 = vector.load %arg6[%c0_52, %c0_53, %c0_54] : memref<1x8x128xf32, #tpu.memory_space<vmem>>, vector<1x8x128xf32>
      %156 = vector.shape_cast %155 : vector<1x8x128xf32> to vector<8x128xf32>
      %157 = vector.shape_cast %140 : vector<8x128xf32> to vector<1x8x128xf32>
      tpu.vector_store %arg6[%c0_52, %c0_53, %c0_54], %157 {strides = array<i32>} : memref<1x8x128xf32, #tpu.memory_space<vmem>>, vector<1x8x128xf32>,
    } else {
    }
    return
  }
  func.func @transform_0(%arg0: i32, %arg1: i32) -> (i32, i32, i32) {
    %c2_i32 = arith.constant 2 : i32
    %0 = arith.muli %c2_i32, %arg1 : i32
    %c0_i32 = arith.constant 0 : i32
    %1 = arith.subi %c0_i32, %0 : i32
    %2 = arith.muli %arg0, %1 : i32
    %3 = arith.addi %arg1, %2 : i32
    %c0_i32_0 = arith.constant 0 : i32
    %c0_i32_1 = arith.constant 0 : i32
    return %3, %c0_i32_0, %arg0 : i32, i32, i32
  }
  func.func @transform_1(%arg0: i32, %arg1: i32) -> (i32, i32, i32) {
    %c0_i32 = arith.constant 0 : i32
    %c0_i32_0 = arith.constant 0 : i32
    %c0_i32_1 = arith.constant 0 : i32
    return %arg0, %c0_i32, %c0_i32_0 : i32, i32, i32
  }
  func.func @transform_2(%arg0: i32, %arg1: i32) -> (i32, i32, i32) {
    %c2_i32 = arith.constant 2 : i32
    %0 = arith.muli %c2_i32, %arg1 : i32
    %c0_i32 = arith.constant 0 : i32
    %1 = arith.subi %c0_i32, %0 : i32
    %2 = arith.muli %arg0, %1 : i32
    %3 = arith.addi %arg1, %2 : i32
    %c0_i32_0 = arith.constant 0 : i32
    %c0_i32_1 = arith.constant 0 : i32
    return %3, %c0_i32_0, %arg0 : i32, i32, i32
  }
  func.func @transform_3(%arg0: i32, %arg1: i32) -> (i32, i32, i32) {
    %c0_i32 = arith.constant 0 : i32
    %c0_i32_0 = arith.constant 0 : i32
    %c0_i32_1 = arith.constant 0 : i32
    return %arg0, %c0_i32, %c0_i32_0 : i32, i32, i32
  }
  func.func @transform_4(%arg0: i32, %arg1: i32) -> (i32, i32, i32) {
    %c0_i32 = arith.constant 0 : i32
    %c0_i32_0 = arith.constant 0 : i32
    %c0_i32_1 = arith.constant 0 : i32
    return %arg0, %c0_i32, %c0_i32_0 : i32, i32, i32
  }
}

</mosaic_0001>

<bundles_post_ra>
// kernel: pblstm_forward.3
= control target key start
LH: loop header
LB: loop body
LE: loop exit
PB: predicated region body
PF: predicated region fallthrough
CT: control target
= control target key end

     0   :  { %10 = vsyncpa [#allocation6], 0  ;;  %s2203_s0 = inlined_call_operand.vmem [shape: f32[4,8,1024], index: 0, kind: input, shape index: {}]   ;;  %s2204_s1 = inlined_call_operand.hbm [shape: bf16[2,128,512], index: 1, kind: input, shape index: {}]   ;;  %s2205_s2 = inlined_call_operand.vmem [shape: f32[4,8,256], index: 2, kind: output, shape index: {0}]   ;;  %s2206_s3 = inlined_call_operand.vmem [shape: f32[2,8,128], index: 3, kind: output, shape index: {1}]   ;;  %s2207_s4 = inlined_call_operand.vmem [shape: f32[2,8,128], index: 4, kind: output, shape index: {2}]  }
   0x1   :  { %12 = vsyncpa [#allocation6 + $0x1], 0  ;;  %s1768_s15 = smov 0   ;;  %s1770_s16 = smov 0  }
   0x2   :  { %s1772_s17 = smov 0   ;;  %s1774_s18 = smov 0  }
   0x3   :  { %s1776_s19 = smov 0   ;;  %s1778_s20 = smov 0  }
   0x4 LB: > { %s1327_s21 = sadd.s32 4294967295, %s1738_s20   ;;  %s30_s22 = sadd.s32 1, %s1734_s19  ;;  %s1738_s20 = sphi %s1778_s20, %s18_s20   ;;  %s1734_s19 = sphi %s1776_s19, %s2215_s19   ;;  %s1730_s18 = sphi %s1774_s18, %s2214_s18   ;;  %s1726_s17 = sphi %s1772_s17, %s2213_s17   ;;  %s1722_s16 = sphi %s1770_s16, %s2212_s16   ;;  %s1718_s15 = sphi %s1768_s15, %s2211_s15  }
   0x5   : > { %p32_p0 = scmp.ge.s32.totalorder %s30_s22, 2  ;;  %s47_s23 = sadd.s32 1, %s1726_s17 }
   0x6   : > { %p54_p1 = scmp.ne.s32.totalorder %s1726_s17, %s1722_s16  ;;  %p55_p2 = scmp.eq.s32.totalorder %s1738_s20, 0 }
   0x7   : > { %s2217_s22 = smov (%p32_p0, %s30_s22), 0  ;;  %p86_p4 = scmp.ne.s32.totalorder %s1722_s16, %s1718_s15 }
   0x8   : > { %p1804_p3 = por %p55_p2, %p54_p1  ;;  %s43_s25 = ssub.s32 %s1734_s19, %s2217_s22 }
   0x9   : > { %p87_p5 = scmp.eq.s32.totalorder %s1327_s21, 0  ;;  %p45_p6 = scmp.eq.s32.totalorder %s43_s25, 0 }
   0xa   : > { %p120_p7 = scmp.eq.s32.totalorder %s1327_s21, 1  ;;  %p1330_p10 = scmp.ge.s32.totalorder %s1738_s20, 2 }
   0xb   : > { %p1811_p8 = por %p87_p5, %p86_p4 }
   0xc   : > { %s1816_s27 = scalar_select %p45_p6, %s1726_s17, %s47_s23  }
   0xd   : > { %p1818_p9 = por %p120_p7, %p54_p1  ;;  %194 = sbr.rel (%p1330_p10) target bundleno = 44 (0x2c), region = 16 }
  0x12   : > { %197 = sbr.rel (!%p1804_p3) target bundleno = 38 (0x26), region = 20  ;;  %s199_s29 = sand.u32 (%p1804_p3), 1, %s1726_s17  }
  0x13   : > { %s1507_s30 = sshll.u32 (%p1804_p3), %s1734_s19, 5  ;;  %s1331_s5 = sshll.u32 (%p1804_p3), %s199_s29, 7 }
  0x14   : > { %s1830_s8 = scalar_lea.vmem (%p1804_p3), %s2203_s0, %s1507_s30  ;;  %s201_s9 = scalar_lea.vmem (%p1804_p3), [#allocation4], %s1331_s5 }
  0x15   : > { %v224_v0 = vld [vmem:[%s1830_s8] sm:$0xff] (%p1804_p3)  ;;  %v226_v1 = vld [vmem:[%s1830_s8 + $0x8] sm:$0xff] (%p1804_p3)  ;;  %v228_v2 = vld [vmem:[%s1830_s8 + $0x10] sm:$0xff] (%p1804_p3) }
  0x16   : > { %225 = vst [vmem:[%s201_s9] sm:$0xff] (%p1804_p3), %v224_v0  ;;  %v230_v3 = vld [vmem:[%s1830_s8 + $0x18] sm:$0xff] (%p1804_p3)  ;;  %v232_v4 = vld [vmem:[%s1830_s8 + $0x40] sm:$0xff] (%p1804_p3)  ;;  %v234_v5 = vld [vmem:[%s1830_s8 + $0x48] sm:$0xff] (%p1804_p3) }
  0x17   : > { %227 = vst [vmem:[%s201_s9 + $0x8] sm:$0xff] %v226_v1  ;;  %v236_v6 = vld [vmem:[%s1830_s8 + $0x50] sm:$0xff]  ;;  %v238_v7 = vld [vmem:[%s1830_s8 + $0x58] sm:$0xff]  ;;  %v240_v8 = vld [vmem:[%s1830_s8 + $0x80] sm:$0xff] }
  0x18   : > { %229 = vst [vmem:[%s201_s9 + $0x10] sm:$0xff] %v228_v2  ;;  %v242_v9 = vld [vmem:[%s1830_s8 + $0x88] sm:$0xff]  ;;  %v244_v10 = vld [vmem:[%s1830_s8 + $0x90] sm:$0xff]  ;;  %v246_v11 = vld [vmem:[%s1830_s8 + $0x98] sm:$0xff] }
  0x19   : > { %231 = vst [vmem:[%s201_s9 + $0x18] sm:$0xff] %v230_v3  ;;  %v248_v12 = vld [vmem:[%s1830_s8 + $0xc0] sm:$0xff]  ;;  %v250_v13 = vld [vmem:[%s1830_s8 + $0xc8] sm:$0xff]  ;;  %v252_v14 = vld [vmem:[%s1830_s8 + $0xd0] sm:$0xff] }
  0x1a   : > { %233 = vst [vmem:[%s201_s9 + $0x20] sm:$0xff] %v232_v4  ;;  %v254_v15 = vld [vmem:[%s1830_s8 + $0xd8] sm:$0xff] }
  0x1b   : > { %235 = vst [vmem:[%s201_s9 + $0x28] sm:$0xff] %v234_v5 }
  0x1c   : > { %237 = vst [vmem:[%s201_s9 + $0x30] sm:$0xff] %v236_v6 }
  0x1d   : > { %239 = vst [vmem:[%s201_s9 + $0x38] sm:$0xff] %v238_v7 }
  0x1e   : > { %241 = vst [vmem:[%s201_s9 + $0x40] sm:$0xff] %v240_v8 }
  0x1f   : > { %243 = vst [vmem:[%s201_s9 + $0x48] sm:$0xff] %v242_v9 }
  0x20   : > { %245 = vst [vmem:[%s201_s9 + $0x50] sm:$0xff] %v244_v10 }
  0x21   : > { %247 = vst [vmem:[%s201_s9 + $0x58] sm:$0xff] %v246_v11 }
  0x22   : > { %249 = vst [vmem:[%s201_s9 + $0x60] sm:$0xff] %v248_v12 }
  0x23   : > { %251 = vst [vmem:[%s201_s9 + $0x68] sm:$0xff] %v250_v13 }
  0x24   : > { %253 = vst [vmem:[%s201_s9 + $0x70] sm:$0xff] %v252_v14 }
  0x25   : > { %255 = vst [vmem:[%s201_s9 + $0x78] sm:$0xff] %v254_v15 }
  0x26 PF: > { %s262_s10 = sand.u32 1, %s1726_s17   ;;  %s1508_s11 = sshll.u32 %s1734_s19, 8 }
  0x27   : > { %s1334_s12 = sshll.u32 %s262_s10, 8  ;;  %s271_s15 = scalar_lea.hbm %s2204_s1, %s1508_s11 }
  0x28   : > { %s272_s21 = sshll.u32 %s271_s15, 4  ;;  %s266_s23 = scalar_lea.vmem [#allocation5], %s1334_s12  ;;  %s273_s21 = int_to_ptr.hbm [resolvable:$true] %s272_s21 }
  0x29   : > { %s274_s25 = sshll.u32 %s266_s23, 4  ;;  %s263_s29 = scalar_lea.sflag [#allocation6], %s262_s10  ;;  %s275_s25 = int_to_ptr.vmem [resolvable:$true] %s274_s25 }
  0x2a   : > { %s1740_s30 = smov 256   ;;  %s1741_s5 = smov 16  }
  0x2b   : > { %1543 = dma.hbm_to_vmem [thread:$0]  (%p1804_p3), %s273_s21, 4096, %s275_s25, %s263_s29, %s1740_s30, %s1740_s30, %s1741_s5  }
  0x2c PF: > { %p1337_p11 = scmp.ge.s32.totalorder %s1738_s20, 1  ;;  %p282_p12 = scmp.lt.s32.totalorder %s1738_s20, 3 }
  0x2e   : > { %p283_p13 = pnand %p1337_p11, %p282_p12 }
  0x2f   : > { %s1858_s6 = sand.u32 (!%p283_p13), 1, %s1722_s16  }
  0x30   : > { %286 = sbr.rel (%p283_p13) target bundleno = 786 (0x312), region = 47  ;;  %s1338_s7 = sshll.u32 (!%p283_p13), %s1858_s6, 7 }
  0x31   : > { %s1339_s8 = sshll.u32 (!%p283_p13), %s1858_s6, 8  ;;  %s1862_s9 = scalar_lea.vmem (!%p283_p13), [#allocation4], %s1338_s7 }
  0x32   : > { %s296_s24 = scalar_lea.sflag (!%p283_p13), [#allocation6], %s1858_s6  ;;  %s1865_s10 = scalar_lea.vmem (!%p283_p13), [#allocation5], %s1339_s8 }
  0x35   : > { %1713 = dma.done.wait (%p1811_p8), %s296_s24, 4096  }
  0x36   : > { %1715 = vsyncadd (%p1811_p8), %s296_s24, 4294963200  ;;  %v1459_v16 = vld [vmem:[%s1865_s10 + $0xe0] sm:$0xf]  ;;  %v1539_v17 = vld [vmem:[%s1865_s10 + $0xec] sm:$0xf0]  ;;  %s1541_s26 = smul.u32 96, %s1730_s18 }
  0x37   : > { %v1537_v18 = vld [vmem:[%s1865_s10 + $0xe4] sm:$0xf]  ;;  %v1874_v19 = vor.u32 %v1539_v17, %v1459_v16  ;;  %v1461_v20 = vld [vmem:[%s1865_s10 + $0xf0] sm:$0xf0]  ;;  %v1538_v21 = vld [vmem:[%s1865_s10 + $0xec] sm:$0xf] }
  0x38   : > { %v1469_v22 = vld [vmem:[%s1865_s10 + $0xf8] sm:$0xf0]  ;;  %v1879_v23 = vor.u32 %v1537_v18, %v1461_v20  ;;  %v1443_v25 = vld [vmem:[%s1865_s10 + $0xc0] sm:$0xf]  ;;  %v1535_v26 = vld [vmem:[%s1865_s10 + $0xcc] sm:$0xf0]  ;;  %s398_s11 = scalar_lea.vmem %s1862_s9, %s1541_s26 [#allocation4] }
  0x39   : > { %v1881_v24 = vor.u32 %v1538_v21, %v1469_v22  ;;  %v1533_v27 = vld [vmem:[%s1865_s10 + $0xc4] sm:$0xf]  ;;  %564 = vmatpush.bf16.msra.mxu0 %v1874_v19  ;;  %v1887_v28 = vor.u32 %v1535_v26, %v1443_v25  ;;  %v1445_v29 = vld [vmem:[%s1865_s10 + $0xd0] sm:$0xf0]  ;;  %v1534_v30 = vld [vmem:[%s1865_s10 + $0xcc] sm:$0xf] }
  0x3a   : > { %v1453_v31 = vld [vmem:[%s1865_s10 + $0xd8] sm:$0xf0]  ;;  %577 = vmatpush.bf16.msra.mxu1 %v1879_v23  ;;  %v1894_v32 = vor.u32 %v1533_v27, %v1445_v29  ;;  %v1467_v34 = vld [vmem:[%s1865_s10 + $0xe8] sm:$0xf]  ;;  %v1540_v35 = vld [vmem:[%s1865_s10 + $0xf4] sm:$0xf0] }
  0x3b   : > { %603 = vmatpush.bf16.msra.mxu3 %v1881_v24  ;;  %v1896_v33 = vor.u32 %v1534_v30, %v1453_v31  ;;  %v1427_v36 = vld [vmem:[%s1865_s10 + $0xa0] sm:$0xf]  ;;  %v1901_v37 = vor.u32 %v1540_v35, %v1467_v34  ;;  %v1531_v38 = vld [vmem:[%s1865_s10 + $0xac] sm:$0xf0]  ;;  %v1529_v39 = vld [vmem:[%s1865_s10 + $0xa4] sm:$0xf] }
  0x3c   : > { %v1429_v40 = vld [vmem:[%s1865_s10 + $0xb0] sm:$0xf0]  ;;  %v1530_v41 = vld [vmem:[%s1865_s10 + $0xac] sm:$0xf]  ;;  %v1437_v42 = vld [vmem:[%s1865_s10 + $0xb8] sm:$0xf0]  ;;  %v1911_v44 = vor.u32 %v1531_v38, %v1427_v36 }
  0x3d   : > { %v1451_v43 = vld [vmem:[%s1865_s10 + $0xc8] sm:$0xf]  ;;  %565 = vmatpush.bf16.msra.mxu0 %v1887_v28  ;;  %590 = vmatpush.bf16.msra.mxu2 %v1901_v37  ;;  %v1536_v45 = vld [vmem:[%s1865_s10 + $0xd4] sm:$0xf0]  ;;  %v1411_v46 = vld [vmem:[%s1865_s10 + $0x80] sm:$0xf]  ;;  %v1918_v48 = vor.u32 %v1529_v39, %v1429_v40  ;;  %v1920_v49 = vor.u32 %v1530_v41, %v1437_v42 }
  0x3e   : > { %v1527_v47 = vld [vmem:[%s1865_s10 + $0x8c] sm:$0xf0]  ;;  %578 = vmatpush.bf16.msra.mxu1 %v1894_v32  ;;  %v1922_v50 = vor.u32 %v1536_v45, %v1451_v43  ;;  %v1525_v51 = vld [vmem:[%s1865_s10 + $0x84] sm:$0xf]  ;;  %v1413_v52 = vld [vmem:[%s1865_s10 + $0x90] sm:$0xf0] }
  0x3f   : > { %604 = vmatpush.bf16.msra.mxu3 %v1896_v33  ;;  %v1526_v53 = vld [vmem:[%s1865_s10 + $0x8c] sm:$0xf]  ;;  %v1421_v54 = vld [vmem:[%s1865_s10 + $0x98] sm:$0xf0]  ;;  %v1435_v55 = vld [vmem:[%s1865_s10 + $0xa8] sm:$0xf]  ;;  %v1932_v57 = vor.u32 %v1527_v47, %v1411_v46  ;;  %v1940_v61 = vor.u32 %v1525_v51, %v1413_v52 }
  0x40   : > { %v1532_v56 = vld [vmem:[%s1865_s10 + $0xb4] sm:$0xf0]  ;;  %v1395_v59 = vld [vmem:[%s1865_s10 + $0x60] sm:$0xf]  ;;  %v1523_v60 = vld [vmem:[%s1865_s10 + $0x6c] sm:$0xf0]  ;;  %v1942_v62 = vor.u32 %v1526_v53, %v1421_v54 }
  0x41   : > { %566 = vmatpush.bf16.msra.mxu0 %v1911_v44  ;;  %591 = vmatpush.bf16.msra.mxu2 %v1922_v50  ;;  %v1934_v58 = vor.u32 %v1532_v56, %v1435_v55  ;;  %v1521_v63 = vld [vmem:[%s1865_s10 + $0x64] sm:$0xf]  ;;  %v1419_v0 = vld [vmem:[%s1865_s10 + $0x88] sm:$0xf]  ;;  %v1528_v1 = vld [vmem:[%s1865_s10 + $0x94] sm:$0xf0]  ;;  %v1952_v5 = vor.u32 %v1523_v60, %v1395_v59 }
  0x42   : > { %579 = vmatpush.bf16.msra.mxu1 %v1918_v48  ;;  %v1397_v2 = vld [vmem:[%s1865_s10 + $0x70] sm:$0xf0]  ;;  %v1522_v3 = vld [vmem:[%s1865_s10 + $0x6c] sm:$0xf]  ;;  %v1405_v4 = vld [vmem:[%s1865_s10 + $0x78] sm:$0xf0]  ;;  %v1954_v6 = vor.u32 %v1528_v1, %v1419_v0 }
  0x43   : > { %605 = vmatpush.bf16.msra.mxu3 %v1920_v49  ;;  %v1379_v7 = vld [vmem:[%s1865_s10 + $0x40] sm:$0xf]  ;;  %v1519_v8 = vld [vmem:[%s1865_s10 + $0x4c] sm:$0xf0]  ;;  %v1960_v9 = vor.u32 %v1521_v63, %v1397_v2  ;;  %v1962_v10 = vor.u32 %v1522_v3, %v1405_v4  ;;  %v1517_v11 = vld [vmem:[%s1865_s10 + $0x44] sm:$0xf] }
  0x44   : > { %v1403_v12 = vld [vmem:[%s1865_s10 + $0x68] sm:$0xf]  ;;  %v1524_v13 = vld [vmem:[%s1865_s10 + $0x74] sm:$0xf0]  ;;  %v1381_v14 = vld [vmem:[%s1865_s10 + $0x50] sm:$0xf0]  ;;  %v1972_v17 = vor.u32 %v1519_v8, %v1379_v7 }
  0x45   : > { %567 = vmatpush.bf16.msra.mxu0 %v1932_v57  ;;  %592 = vmatpush.bf16.msra.mxu2 %v1934_v58  ;;  %v1518_v15 = vld [vmem:[%s1865_s10 + $0x4c] sm:$0xf]  ;;  %v1389_v16 = vld [vmem:[%s1865_s10 + $0x58] sm:$0xf0]  ;;  %v1974_v18 = vor.u32 %v1524_v13, %v1403_v12  ;;  %v1363_v20 = vld [vmem:[%s1865_s10 + $0x20] sm:$0xf]  ;;  %v1980_v22 = vor.u32 %v1517_v11, %v1381_v14 }
  0x46   : > { %580 = vmatpush.bf16.msra.mxu1 %v1940_v61  ;;  %v1515_v21 = vld [vmem:[%s1865_s10 + $0x2c] sm:$0xf0]  ;;  %v1982_v25 = vor.u32 %v1518_v15, %v1389_v16  ;;  %v1513_v26 = vld [vmem:[%s1865_s10 + $0x24] sm:$0xf]  ;;  %v1387_v27 = vld [vmem:[%s1865_s10 + $0x48] sm:$0xf] }
  0x47   : > { %606 = vmatpush.bf16.msra.mxu3 %v1942_v62  ;;  %v1520_v29 = vld [vmem:[%s1865_s10 + $0x54] sm:$0xf0]  ;;  %v1365_v30 = vld [vmem:[%s1865_s10 + $0x30] sm:$0xf0]  ;;  %v1514_v31 = vld [vmem:[%s1865_s10 + $0x2c] sm:$0xf]  ;;  %v1992_v35 = vor.u32 %v1515_v21, %v1363_v20 }
  0x48   : > { %v1373_v34 = vld [vmem:[%s1865_s10 + $0x38] sm:$0xf0]  ;;  %v1994_v36 = vor.u32 %v1520_v29, %v1387_v27  ;;  %v1347_v38 = vld [vmem:[%s1865_s10] sm:$0xf]  ;;  %v1511_v39 = vld [vmem:[%s1865_s10 + $0xc] sm:$0xf0]  ;;  %v2000_v40 = vor.u32 %v1513_v26, %v1365_v30 }
  0x49   : > { %568 = vmatpush.bf16.msra.mxu0 %v1952_v5  ;;  %593 = vmatpush.bf16.msra.mxu2 %v1954_v6  ;;  %v2002_v41 = vor.u32 %v1514_v31, %v1373_v34  ;;  %v1509_v42 = vld [vmem:[%s1865_s10 + $0x4] sm:$0xf]  ;;  %v1371_v43 = vld [vmem:[%s1865_s10 + $0x28] sm:$0xf]  ;;  %v1516_v45 = vld [vmem:[%s1865_s10 + $0x34] sm:$0xf0]  ;;  %v2012_v52 = vor.u32 %v1511_v39, %v1347_v38 }
  0x4a   : > { %581 = vmatpush.bf16.msra.mxu1 %v1960_v9  ;;  %v1349_v46 = vld [vmem:[%s1865_s10 + $0x10] sm:$0xf0]  ;;  %v1510_v47 = vld [vmem:[%s1865_s10 + $0xc] sm:$0xf]  ;;  %v1357_v51 = vld [vmem:[%s1865_s10 + $0x18] sm:$0xf0]  ;;  %v2014_v53 = vor.u32 %v1516_v45, %v1371_v43 }
  0x4b   : > { %607 = vmatpush.bf16.msra.mxu3 %v1962_v10  ;;  %v2018_v54 = vor.u32 %v1509_v42, %v1349_v46  ;;  %v2020_v55 = vor.u32 %v1510_v47, %v1357_v51  ;;  %v1355_v56 = vld [vmem:[%s1865_s10 + $0x8] sm:$0xf]  ;;  %v1512_v59 = vld [vmem:[%s1865_s10 + $0x14] sm:$0xf0]  ;;  %v1742_v63 = vmov 0.0|0.0   ;;  %v399_v0 = vld [vmem:[%s398_s11] sm:$0xff] }
  0x4c   : > { %v2028_v60 = vor.u32 %v1512_v59, %v1355_v56  ;;  %v400_v1 = vld [vmem:[%s398_s11 + $0x8] sm:$0xff]  ;;  %v402_v12 = vld [vmem:[%s398_s11 + $0x18] sm:$0xff]  ;;  %v401_v31 = vld [vmem:[%s398_s11 + $0x10] sm:$0xff]  ;;  %s1340_s12 = sshll.u32 %s1858_s6, 5  ;;  %s1476_s13 = smul.u32 24, %s1730_s18 }
  0x4d   : > { %569 = vmatpush.bf16.msra.mxu0 %v1972_v17  ;;  %594 = vmatpush.bf16.msra.mxu2 %v1974_v18  ;;  %s2102_s14 = scalar_lea.vmem [#allocation7], %s1340_s12  ;;  %s1477_s21 = sshll.u32 %s1730_s18, 5 }
  0x4e   : > { %582 = vmatpush.bf16.msra.mxu1 %v1980_v22  ;;  %s684_s15 = scalar_lea.vmem %s2102_s14, %s1476_s13 [#allocation7]  ;;  %s1229_s23 = scalar_lea.vmem %s1862_s9, %s1477_s21 [#allocation4] }
  0x4f   : > { %608 = vmatpush.bf16.msra.mxu3 %v1982_v25  ;;  %s1485_s25 = sshll.u32 %s1730_s18, 3  ;;  %s817_s30 = ssub.s32 2, %s1730_s18 }
  0x50   : > { %s1232_s29 = scalar_lea.vmem %s2102_s14, %s1485_s25 [#allocation7]  ;;  %s1542_s5 = sshll.u32 %s817_s30, 5 }
  0x51   : > { %570 = vmatpush.bf16.msra.mxu0 %v1992_v35  ;;  %595 = vmatpush.bf16.msra.mxu2 %v1994_v36  ;;  %s820_s6 = scalar_lea.vmem %s1862_s9, %s1542_s5 [#allocation4]  ;;  %s1492_s7 = sshll.u32 %s817_s30, 3 }
  0x52   : > { %583 = vmatpush.bf16.msra.mxu1 %v2000_v40  ;;  %s946_s8 = scalar_lea.vmem %s2102_s14, %s1492_s7 [#allocation7]  ;;  %s1493_s24 = smul.u32 4294967200, %s1730_s18 }
  0x53   : > { %609 = vmatpush.bf16.msra.mxu3 %v2002_v41  ;;  %p347_p0 = scmp.lt.s32.totalorder %s1730_s18, 1  ;;  %s1110_s7 = scalar_lea.vmem (%p1818_p9), %s2205_s2, %s1485_s25 }
  0x54   : > { %s1240_s10 = scalar_lea.vmem %s1862_s9, %s1493_s24 [#allocation4] }
  0x55   : > { %571 = vmatpush.bf16.msra.mxu0 %v2012_v52  ;;  %596 = vmatpush.bf16.msra.mxu2 %v2014_v53  ;;  %s2162_s9 = scalar_select %p347_p0, %s1730_s18, 1 }
  0x56   : > { %584 = vmatpush.bf16.msra.mxu1 %v2018_v54 }
  0x57   : > { %610 = vmatpush.bf16.msra.mxu3 %v2020_v55  ;;  %s1341_s26 = sshll.u32 %s2162_s9, 3 }
  0x58   : > { %572 = vmatmul.bf16.vlgmr.msra.gmra.mxu0 %v1742_v63  ;;  %s354_s13 = scalar_lea.vmem %s2207_s4, %s1341_s26  ;;  %s350_s30 = scalar_lea.vmem %s2206_s3, %s1341_s26 }
  0x59   : > { %695 = vmatpush.bf16.msrb.mxu0 %v1874_v19  ;;  %585 = vmatmul.bf16.vlgmr.msra.gmra.mxu1 %v1742_v63 }
  0x5a   : > { %708 = vmatpush.bf16.msrb.mxu1 %v1879_v23  ;;  %611 = vmatmul.bf16.vlgmr.msra.gmra.mxu3 %v1742_v63 }
  0x5b   : > { %734 = vmatpush.bf16.msrb.mxu3 %v1881_v24  ;;  %597 = vmatpush.bf16.msra.mxu2 %v2028_v60 }
  0x5d   : > { %696 = vmatpush.bf16.msrb.mxu0 %v1887_v28 }
  0x5e   : > { %709 = vmatpush.bf16.msrb.mxu1 %v1894_v32  ;;  %598 = vmatmul.bf16.vlgmr.msra.gmra.mxu2 %v1742_v63 }
  0x5f   : > { %721 = vmatpush.bf16.msrb.mxu2 %v1901_v37  ;;  %735 = vmatpush.bf16.msrb.mxu3 %v1896_v33 }
  0x61   : > { %697 = vmatpush.bf16.msrb.mxu0 %v1911_v44 }
  0x62   : > { %710 = vmatpush.bf16.msrb.mxu1 %v1918_v48 }
  0x63   : > { %722 = vmatpush.bf16.msrb.mxu2 %v1922_v50  ;;  %736 = vmatpush.bf16.msrb.mxu3 %v1920_v49 }
  0x65   : > { %698 = vmatpush.bf16.msrb.mxu0 %v1932_v57 }
  0x66   : > { %711 = vmatpush.bf16.msrb.mxu1 %v1940_v61 }
  0x67   : > { %723 = vmatpush.bf16.msrb.mxu2 %v1934_v58  ;;  %737 = vmatpush.bf16.msrb.mxu3 %v1942_v62 }
  0x69   : > { %699 = vmatpush.bf16.msrb.mxu0 %v1952_v5 }
  0x6a   : > { %712 = vmatpush.bf16.msrb.mxu1 %v1960_v9 }
  0x6b   : > { %724 = vmatpush.bf16.msrb.mxu2 %v1954_v6  ;;  %738 = vmatpush.bf16.msrb.mxu3 %v1962_v10 }
  0x6d   : > { %700 = vmatpush.bf16.msrb.mxu0 %v1972_v17 }
  0x6e   : > { %713 = vmatpush.bf16.msrb.mxu1 %v1980_v22 }
  0x6f   : > { %725 = vmatpush.bf16.msrb.mxu2 %v1974_v18  ;;  %739 = vmatpush.bf16.msrb.mxu3 %v1982_v25 }
  0x71   : > { %701 = vmatpush.bf16.msrb.mxu0 %v1992_v35 }
  0x72   : > { %714 = vmatpush.bf16.msrb.mxu1 %v2000_v40 }
  0x73   : > { %726 = vmatpush.bf16.msrb.mxu2 %v1994_v36  ;;  %740 = vmatpush.bf16.msrb.mxu3 %v2002_v41 }
  0x75   : > { %702 = vmatpush.bf16.msrb.mxu0 %v2012_v52 }
  0x76   : > { %715 = vmatpush.bf16.msrb.mxu1 %v2018_v54 }
  0x77   : > { %727 = vmatpush.bf16.msrb.mxu2 %v2014_v53  ;;  %741 = vmatpush.bf16.msrb.mxu3 %v2020_v55 }
  0x79   : > { %826 = vmatpush.bf16.msra.mxu0 %v1874_v19 }
  0x7a   : > { %839 = vmatpush.bf16.msra.mxu1 %v1879_v23 }
  0x7b   : > { %865 = vmatpush.bf16.msra.mxu3 %v1881_v24  ;;  %728 = vmatpush.bf16.msrb.mxu2 %v2028_v60 }
  0x7d   : > { %827 = vmatpush.bf16.msra.mxu0 %v1887_v28 }
  0x7e   : > { %840 = vmatpush.bf16.msra.mxu1 %v1894_v32 }
  0x7f   : > { %852 = vmatpush.bf16.msra.mxu2 %v1901_v37  ;;  %866 = vmatpush.bf16.msra.mxu3 %v1896_v33 }
  0x81   : > { %828 = vmatpush.bf16.msra.mxu0 %v1911_v44 }
  0x82   : > { %841 = vmatpush.bf16.msra.mxu1 %v1918_v48 }
  0x83   : > { %853 = vmatpush.bf16.msra.mxu2 %v1922_v50  ;;  %867 = vmatpush.bf16.msra.mxu3 %v1920_v49 }
  0x85   : > { %829 = vmatpush.bf16.msra.mxu0 %v1932_v57 }
  0x86   : > { %842 = vmatpush.bf16.msra.mxu1 %v1940_v61 }
  0x87   : > { %854 = vmatpush.bf16.msra.mxu2 %v1934_v58  ;;  %868 = vmatpush.bf16.msra.mxu3 %v1942_v62 }
  0x89   : > { %830 = vmatpush.bf16.msra.mxu0 %v1952_v5 }
  0x8a   : > { %843 = vmatpush.bf16.msra.mxu1 %v1960_v9 }
  0x8b   : > { %855 = vmatpush.bf16.msra.mxu2 %v1954_v6  ;;  %869 = vmatpush.bf16.msra.mxu3 %v1962_v10 }
  0x8d   : > { %831 = vmatpush.bf16.msra.mxu0 %v1972_v17 }
  0x8e   : > { %844 = vmatpush.bf16.msra.mxu1 %v1980_v22 }
  0x8f   : > { %856 = vmatpush.bf16.msra.mxu2 %v1974_v18  ;;  %870 = vmatpush.bf16.msra.mxu3 %v1982_v25 }
  0x91   : > { %832 = vmatpush.bf16.msra.mxu0 %v1992_v35 }
  0x92   : > { %845 = vmatpush.bf16.msra.mxu1 %v2000_v40 }
  0x93   : > { %857 = vmatpush.bf16.msra.mxu2 %v1994_v36  ;;  %871 = vmatpush.bf16.msra.mxu3 %v2002_v41 }
  0x95   : > { %833 = vmatpush.bf16.msra.mxu0 %v2012_v52 }
  0x96   : > { %846 = vmatpush.bf16.msra.mxu1 %v2018_v54 }
  0x97   : > { %858 = vmatpush.bf16.msra.mxu2 %v2014_v53  ;;  %872 = vmatpush.bf16.msra.mxu3 %v2020_v55 }
  0x9b   : > { %859 = vmatpush.bf16.msra.mxu2 %v2028_v60 }
  0xd5   : > { %v573_v2 = vpop.f32.mrf.mxu0 }
  0xd6   : > { %v616_v3 = vadd.f32 %v573_v2, %v399_v0  ;;  %v586_v4 = vpop.f32.mrf.mxu1 }
  0xd7   : > { %v617_v7 = vadd.f32 %v586_v4, %v400_v1 }
  0xd8   : > { %v1473_v8 = vmul.f32 -1.442695, %v616_v3 }
  0xd9   : > { %v1474_v11 = vmul.f32 -1.442695, %v617_v7 }
  0xda   : > { %1596 = vpow2.f32 %v1473_v8 }
  0xdb   : > { %1598 = vpow2.f32 %v1474_v11 }
  0xdd   : > { %v612_v13 = vpop.f32.mrf.mxu3  ;;  %v575_v15 = vpop.f32.mrf.mxu0 }
  0xde   : > { %v619_v14 = vadd.f32 %v612_v13, %v402_v12  ;;  %v588_v16 = vpop.f32.mrf.mxu1 }
  0xe0   : > { %v1475_v20 = vmul.f32 -1.442695, %v619_v14  ;;  %v1597_v21 = vpop.eup %1596 }
  0xe1   : > { %v599_v26 = vpop.f32.mrf.mxu2  ;;  %v1599_v27 = vpop.eup %1598  ;;  %v626_v29 = vadd.f32 1.0, %v1597_v21 }
  0xe2   : > { %1600 = vpow2.f32 %v1475_v20  ;;  %v627_v30 = vadd.f32 1.0, %v1599_v27  ;;  %v618_v39 = vadd.f32 %v599_v26, %v401_v31 }
  0xe3   : > { %1602 = vrcp.f32 %v626_v29  ;;  %v639_v63 = vand.u32 2147483648, %v626_v29  ;;  %v637_v2 = vand.u32 2147483647, %v626_v29  ;;  %vm633_vm2 = vweird.f32 %v626_v29 }
  0xe4   : > { %1604 = vrcp.f32 %v627_v30  ;;  %v654_v0 = vand.u32 2147483648, %v627_v30  ;;  %v652_v4 = vand.u32 2147483647, %v627_v30  ;;  %vm648_vm3 = vweird.f32 %v627_v30 }
  0xe5   : > { %v614_v34 = vpop.f32.mrf.mxu3  ;;  %v640_v13 = vor.u32 1.1754944e-38, %v639_v63  ;;  %vm638_vm5 = vcmp.eq.f32.partialorder %v637_v2, 8.507059e+37 }
  0xe6   : > { %v655_v15 = vor.u32 1.1754944e-38, %v654_v0  ;;  %vm653_vm7 = vcmp.eq.f32.partialorder %v652_v4, 8.507059e+37 }
  0xe8   : > { %v1601_v38 = vpop.eup %1600 }
  0xe9   : > { %v662_v42 = vadd.f32 1.0, %v1601_v38  ;;  %v601_v43 = vpop.f32.mrf.mxu2  ;;  %v1603_v45 = vpop.eup %1602 }
  0xea   : > { %v1605_v46 = vpop.eup %1604  ;;  %v629_v47 = vmul.f32 %v1603_v45, %v626_v29  ;;  %vm634_vm0 = vweird.f32 %v1603_v45 }
  0xeb   : > { %1606 = vrcp.f32 %v662_v42  ;;  %v644_v51 = vmul.f32 %v1605_v46, %v627_v30  ;;  %vm649_vm1 = vweird.f32 %v1605_v46  ;;  %vm635_vm4 = vmor %vm633_vm2, %vm634_vm0  ;;  %vm668_vm9 = vweird.f32 %v662_v42 }
  0xec   : > { %1608 = vtanh.f32 %v618_v39  ;;  %v630_v56 = vsub.f32 1.0, %v629_v47  ;;  %vm650_vm6 = vmor %vm648_vm3, %vm649_vm1  ;;  %v674_v39 = vand.u32 2147483648, %v662_v42  ;;  %v672_v43 = vand.u32 2147483647, %v662_v42 }
  0xed   : > { %v645_v59 = vsub.f32 1.0, %v644_v51 }
  0xee   : > { %v631_v1 = vmul.f32 %v1603_v45, %v630_v56  ;;  %v675_v47 = vor.u32 1.1754944e-38, %v674_v39  ;;  %vm673_vm11 = vcmp.eq.f32.partialorder %v672_v43, 8.507059e+37 }
  0xef   : > { %v646_v3 = vmul.f32 %v1605_v46, %v645_v59 }
  0xf0   : > { %v632_v8 = vadd.f32 %v1603_v45, %v631_v1 }
  0xf1   : > { %v1607_v7 = vpop.eup %1606  ;;  %v647_v14 = vadd.f32 %v1605_v46, %v646_v3 }
  0xf2   : > { %v1609_v11 = vpop.eup %1608  ;;  %v664_v12 = vmul.f32 %v1607_v7, %v662_v42  ;;  %v636_v16 = vsel %vm635_vm4, %v1603_v45, %v632_v8  ;;  %vm669_vm8 = vweird.f32 %v1607_v7 }
  0xf3   : > { %v641_v21 = vsel %vm638_vm5, %v640_v13, %v636_v16  ;;  %v651_v26 = vsel %vm650_vm6, %v1605_v46, %v647_v14  ;;  %vm670_vm10 = vmor %vm668_vm9, %vm669_vm8 }
  0xf4   : > { %v665_v20 = vsub.f32 1.0, %v664_v12  ;;  %v656_v27 = vsel %vm653_vm7, %v655_v15, %v651_v26  ;;  %v679_v31 = vmul.f32 %v1609_v11, %v641_v21 }
  0xf5   : > { %v678_v29 = vmul.f32 0.0, %v656_v27 }
  0xf6   : > { %v666_v34 = vmul.f32 %v1607_v7, %v665_v20 }
  0xf7   : > { %v2097_v38 = vadd.f32 %v679_v31, %v678_v29 }
  0xf8   : > { %v667_v30 = vadd.f32 %v1607_v7, %v666_v34 }
  0xf9   : > { %1610 = vtanh.f32 %v2097_v38 }
  0xfa   : > { %v671_v45 = vsel %vm670_vm10, %v1607_v7, %v667_v30 }
  0xfb   : > { %v676_v51 = vsel %vm673_vm11, %v675_v47, %v671_v45 }
  0xff   : > { %v1611_v46 = vpop.eup %1610 }
 0x100   : > { %v682_v56 = vmul.f32 %v1611_v46, %v676_v51 }
 0x102   : > { %v694_v59 = vpack.c.bf16 %v682_v56, %v682_v56  ;;  %685 = vst [vmem:[%s684_s15] sm:$0xff] %v682_v56  ;;  %v821_v56 = vld [vmem:[%s820_s6] sm:$0xff]  ;;  %s1501_s15 = smul.u32 4294967272, %s1730_s18 }
 0x104   : > { %703 = vmatmul.bf16.vlgmr.msrb.gmra.mxu0 %v694_v59  ;;  %716 = vmatmul.bf16.vlgmr.msrb.gmra.mxu1 %v694_v59  ;;  %s1244_s21 = scalar_lea.vmem %s2102_s14, %s1501_s15 [#allocation7] }
 0x105   : > { %729 = vmatmul.bf16.vlgmr.msrb.gmra.mxu2 %v694_v59  ;;  %742 = vmatmul.bf16.vlgmr.msrb.gmra.mxu3 %v694_v59  ;;  %v822_v59 = vld [vmem:[%s820_s6 + $0x8] sm:$0xff] }
 0x106   : > { %958 = vmatpush.bf16.msrb.mxu0 %v1874_v19  ;;  %971 = vmatpush.bf16.msrb.mxu1 %v1879_v23  ;;  %v1478_v19 = vld [vmem:[%s1229_s23 + $0x20] sm:$0xff]  ;;  %v1479_v23 = vld [vmem:[%s1229_s23 + $0x28] sm:$0xff] }
 0x107   : > { %984 = vmatpush.bf16.msrb.mxu2 %v1901_v37  ;;  %997 = vmatpush.bf16.msrb.mxu3 %v1881_v24 }
 0x10a   : > { %959 = vmatpush.bf16.msrb.mxu0 %v1887_v28  ;;  %972 = vmatpush.bf16.msrb.mxu1 %v1894_v32 }
 0x10b   : > { %985 = vmatpush.bf16.msrb.mxu2 %v1922_v50  ;;  %998 = vmatpush.bf16.msrb.mxu3 %v1896_v33 }
 0x10e   : > { %960 = vmatpush.bf16.msrb.mxu0 %v1911_v44  ;;  %973 = vmatpush.bf16.msrb.mxu1 %v1918_v48  ;;  %v1481_v48 = vld [vmem:[%s1229_s23 + $0x38] sm:$0xff] }
 0x10f   : > { %986 = vmatpush.bf16.msrb.mxu2 %v1934_v58  ;;  %999 = vmatpush.bf16.msrb.mxu3 %v1920_v49 }
 0x112   : > { %961 = vmatpush.bf16.msrb.mxu0 %v1932_v57  ;;  %974 = vmatpush.bf16.msrb.mxu1 %v1940_v61 }
 0x113   : > { %987 = vmatpush.bf16.msrb.mxu2 %v1954_v6  ;;  %1000 = vmatpush.bf16.msrb.mxu3 %v1942_v62 }
 0x116   : > { %962 = vmatpush.bf16.msrb.mxu0 %v1952_v5  ;;  %975 = vmatpush.bf16.msrb.mxu1 %v1960_v9 }
 0x117   : > { %988 = vmatpush.bf16.msrb.mxu2 %v1974_v18  ;;  %1001 = vmatpush.bf16.msrb.mxu3 %v1962_v10 }
 0x11a   : > { %963 = vmatpush.bf16.msrb.mxu0 %v1972_v17  ;;  %976 = vmatpush.bf16.msrb.mxu1 %v1980_v22  ;;  %v1480_v22 = vld [vmem:[%s1229_s23 + $0x30] sm:$0xff] }
 0x11b   : > { %989 = vmatpush.bf16.msrb.mxu2 %v1994_v36  ;;  %1002 = vmatpush.bf16.msrb.mxu3 %v1982_v25 }
 0x11e   : > { %964 = vmatpush.bf16.msrb.mxu0 %v1992_v35  ;;  %977 = vmatpush.bf16.msrb.mxu1 %v2000_v40 }
 0x11f   : > { %990 = vmatpush.bf16.msrb.mxu2 %v2014_v53  ;;  %1003 = vmatpush.bf16.msrb.mxu3 %v2002_v41 }
 0x122   : > { %965 = vmatpush.bf16.msrb.mxu0 %v2012_v52  ;;  %978 = vmatpush.bf16.msrb.mxu1 %v2018_v54 }
 0x123   : > { %991 = vmatpush.bf16.msrb.mxu2 %v2028_v60  ;;  %1004 = vmatpush.bf16.msrb.mxu3 %v2020_v55 }
 0x181   : > { %v704_v24 = vpop.f32.mrf.mxu0  ;;  %v717_v28 = vpop.f32.mrf.mxu1 }
 0x182   : > { %v747_v32 = vadd.f32 %v1478_v19, %v704_v24  ;;  %v748_v33 = vadd.f32 %v1479_v23, %v717_v28 }
 0x184   : > { %v1482_v37 = vmul.f32 -1.442695, %v747_v32  ;;  %v1483_v44 = vmul.f32 -1.442695, %v748_v33 }
 0x186   : > { %1612 = vpow2.f32 %v1482_v37  ;;  %v824_v37 = vld [vmem:[%s820_s6 + $0x18] sm:$0xff] }
 0x187   : > { %1614 = vpow2.f32 %v1483_v44 }
 0x188   : > { %v730_v49 = vpop.f32.mrf.mxu2  ;;  %v743_v50 = vpop.f32.mrf.mxu3 }
 0x189   : > { %v750_v57 = vadd.f32 %v1481_v48, %v743_v50  ;;  %v706_v58 = vpop.f32.mrf.mxu0  ;;  %v719_v61 = vpop.f32.mrf.mxu1  ;;  %v749_v40 = vadd.f32 %v1480_v22, %v730_v49 }
 0x18b   : > { %v1484_v62 = vmul.f32 -1.442695, %v750_v57 }
 0x18c   : > { %v1613_v5 = vpop.eup %1612 }
 0x18d   : > { %v1615_v6 = vpop.eup %1614  ;;  %v757_v9 = vadd.f32 1.0, %v1613_v5  ;;  %1616 = vpow2.f32 %v1484_v62 }
 0x18e   : > { %v758_v10 = vadd.f32 1.0, %v1615_v6 }
 0x18f   : > { %1618 = vrcp.f32 %v757_v9  ;;  %v770_v60 = vand.u32 2147483648, %v757_v9  ;;  %v768_v0 = vand.u32 2147483647, %v757_v9  ;;  %vm764_vm14 = vweird.f32 %v757_v9 }
 0x190   : > { %1620 = vrcp.f32 %v758_v10  ;;  %v732_v17 = vpop.f32.mrf.mxu2  ;;  %v745_v18 = vpop.f32.mrf.mxu3  ;;  %v785_v42 = vand.u32 2147483648, %v758_v10  ;;  %v783_v2 = vand.u32 2147483647, %v758_v10  ;;  %vm779_vm15 = vweird.f32 %v758_v10 }
 0x191   : > { %v771_v7 = vor.u32 1.1754944e-38, %v770_v60  ;;  %vm769_vm2 = vcmp.eq.f32.partialorder %v768_v0, 8.507059e+37  ;;  %v823_v17 = vld [vmem:[%s820_s6 + $0x10] sm:$0xff] }
 0x192   : > { %v786_v12 = vor.u32 1.1754944e-38, %v785_v42  ;;  %vm784_vm3 = vcmp.eq.f32.partialorder %v783_v2, 8.507059e+37 }
 0x193   : > { %v1617_v25 = vpop.eup %1616 }
 0x194   : > { %v793_v35 = vadd.f32 1.0, %v1617_v25 }
 0x195   : > { %v1619_v36 = vpop.eup %1618 }
 0x196   : > { %v1621_v41 = vpop.eup %1620  ;;  %v760_v52 = vmul.f32 %v1619_v36, %v757_v9  ;;  %1622 = vrcp.f32 %v793_v35  ;;  %vm765_vm12 = vweird.f32 %v1619_v36  ;;  %v805_v30 = vand.u32 2147483648, %v793_v35 }
 0x197   : > { %v775_v53 = vmul.f32 %v1621_v41, %v758_v10  ;;  %1624 = vtanh.f32 %v749_v40  ;;  %vm780_vm13 = vweird.f32 %v1621_v41  ;;  %vm766_vm0 = vmor %vm764_vm14, %vm765_vm12  ;;  %vm799_vm5 = vweird.f32 %v793_v35 }
 0x198   : > { %v761_v54 = vsub.f32 1.0, %v760_v52  ;;  %vm781_vm1 = vmor %vm779_vm15, %vm780_vm13  ;;  %v803_v39 = vand.u32 2147483647, %v793_v35  ;;  %v806_v45 = vor.u32 1.1754944e-38, %v805_v30 }
 0x199   : > { %v776_v55 = vsub.f32 1.0, %v775_v53 }
 0x19a   : > { %v762_v63 = vmul.f32 %v1619_v36, %v761_v54  ;;  %vm804_vm7 = vcmp.eq.f32.partialorder %v803_v39, 8.507059e+37 }
 0x19b   : > { %v777_v1 = vmul.f32 %v1621_v41, %v776_v55 }
 0x19c   : > { %v1623_v3 = vpop.eup %1622  ;;  %v763_v4 = vadd.f32 %v1619_v36, %v762_v63 }
 0x19d   : > { %v778_v8 = vadd.f32 %v1621_v41, %v777_v1  ;;  %v795_v11 = vmul.f32 %v1623_v3, %v793_v35  ;;  %v1625_v14 = vpop.eup %1624  ;;  %vm800_vm4 = vweird.f32 %v1623_v3 }
 0x19e   : > { %v767_v13 = vsel %vm766_vm0, %v1619_v36, %v763_v4  ;;  %vm801_vm6 = vmor %vm799_vm5, %vm800_vm4 }
 0x19f   : > { %v772_v15 = vsel %vm769_vm2, %v771_v7, %v767_v13  ;;  %v782_v16 = vsel %vm781_vm1, %v1621_v41, %v778_v8  ;;  %v796_v20 = vsub.f32 1.0, %v795_v11 }
 0x1a0   : > { %v787_v21 = vsel %vm784_vm3, %v786_v12, %v782_v16  ;;  %v810_v26 = vmul.f32 %v1625_v14, %v772_v15 }
 0x1a1   : > { %v809_v27 = vmul.f32 %v787_v21, %v2097_v38  ;;  %v797_v31 = vmul.f32 %v1623_v3, %v796_v20 }
 0x1a3   : > { %v2140_v34 = vadd.f32 %v810_v26, %v809_v27  ;;  %v798_v29 = vadd.f32 %v1623_v3, %v797_v31 }
 0x1a5   : > { %1626 = vtanh.f32 %v2140_v34  ;;  %v802_v43 = vsel %vm801_vm6, %v1623_v3, %v798_v29 }
 0x1a6   : > { %v807_v47 = vsel %vm804_vm7, %v806_v45, %v802_v43 }
 0x1ab   : > { %v1627_v38 = vpop.eup %1626 }
 0x1ac   : > { %v813_v46 = vmul.f32 %v1627_v38, %v807_v47 }
 0x1ae   : > { %v825_v51 = vpack.c.bf16 %v813_v46, %v813_v46  ;;  %1486 = vst [vmem:[%s1232_s29 + $0x8] sm:$0xff] %v813_v46  ;;  %v1494_v46 = vld [vmem:[%s1240_s10 + $0x60] sm:$0xff] }
 0x1b0   : > { %834 = vmatmul.bf16.vlgmr.msra.gmra.mxu0 %v825_v51  ;;  %847 = vmatmul.bf16.vlgmr.msra.gmra.mxu1 %v825_v51 }
 0x1b1   : > { %860 = vmatmul.bf16.vlgmr.msra.gmra.mxu2 %v825_v51  ;;  %873 = vmatmul.bf16.vlgmr.msra.gmra.mxu3 %v825_v51  ;;  %v1495_v51 = vld [vmem:[%s1240_s10 + $0x68] sm:$0xff] }
 0x22d   : > { %v835_v19 = vpop.f32.mrf.mxu0  ;;  %v848_v23 = vpop.f32.mrf.mxu1 }
 0x22e   : > { %v878_v24 = vadd.f32 %v835_v19, %v821_v56  ;;  %v879_v28 = vadd.f32 %v848_v23, %v822_v59 }
 0x230   : > { %v1489_v32 = vmul.f32 -1.442695, %v878_v24  ;;  %v1490_v33 = vmul.f32 -1.442695, %v879_v28 }
 0x232   : > { %1628 = vpow2.f32 %v1489_v32  ;;  %v1497_v32 = vld [vmem:[%s1240_s10 + $0x78] sm:$0xff] }
 0x233   : > { %1630 = vpow2.f32 %v1490_v33 }
 0x234   : > { %v861_v44 = vpop.f32.mrf.mxu2  ;;  %v874_v48 = vpop.f32.mrf.mxu3 }
 0x235   : > { %v881_v49 = vadd.f32 %v874_v48, %v824_v37  ;;  %v837_v50 = vpop.f32.mrf.mxu0  ;;  %v850_v57 = vpop.f32.mrf.mxu1  ;;  %v880_v35 = vadd.f32 %v861_v44, %v823_v17 }
 0x237   : > { %v1491_v58 = vmul.f32 -1.442695, %v881_v49 }
 0x238   : > { %v1629_v61 = vpop.eup %1628 }
 0x239   : > { %v1631_v62 = vpop.eup %1630  ;;  %v888_v5 = vadd.f32 1.0, %v1629_v61  ;;  %1632 = vpow2.f32 %v1491_v58 }
 0x23a   : > { %v889_v6 = vadd.f32 1.0, %v1631_v62 }
 0x23b   : > { %1634 = vrcp.f32 %v888_v5  ;;  %v901_v54 = vand.u32 2147483648, %v888_v5  ;;  %v899_v42 = vand.u32 2147483647, %v888_v5  ;;  %vm895_vm10 = vweird.f32 %v888_v5 }
 0x23c   : > { %1636 = vrcp.f32 %v889_v6  ;;  %v863_v9 = vpop.f32.mrf.mxu2  ;;  %v876_v10 = vpop.f32.mrf.mxu3  ;;  %v916_v55 = vand.u32 2147483648, %v889_v6  ;;  %v914_v0 = vand.u32 2147483647, %v889_v6  ;;  %vm910_vm11 = vweird.f32 %v889_v6 }
 0x23d   : > { %v902_v3 = vor.u32 1.1754944e-38, %v901_v54  ;;  %vm900_vm14 = vcmp.eq.f32.partialorder %v899_v42, 8.507059e+37  ;;  %v1496_v9 = vld [vmem:[%s1240_s10 + $0x70] sm:$0xff] }
 0x23e   : > { %v917_v8 = vor.u32 1.1754944e-38, %v916_v55  ;;  %vm915_vm15 = vcmp.eq.f32.partialorder %v914_v0, 8.507059e+37 }
 0x23f   : > { %v1633_v18 = vpop.eup %1632 }
 0x240   : > { %v924_v22 = vadd.f32 1.0, %v1633_v18 }
 0x241   : > { %v1635_v25 = vpop.eup %1634 }
 0x242   : > { %v1637_v36 = vpop.eup %1636  ;;  %v891_v40 = vmul.f32 %v1635_v25, %v888_v5  ;;  %1638 = vrcp.f32 %v924_v22  ;;  %vm896_vm8 = vweird.f32 %v1635_v25  ;;  %v936_v29 = vand.u32 2147483648, %v924_v22 }
 0x243   : > { %v906_v41 = vmul.f32 %v1637_v36, %v889_v6  ;;  %1640 = vtanh.f32 %v880_v35  ;;  %vm911_vm9 = vweird.f32 %v1637_v36  ;;  %vm897_vm12 = vmor %vm895_vm10, %vm896_vm8  ;;  %vm930_vm1 = vweird.f32 %v924_v22 }
 0x244   : > { %v892_v52 = vsub.f32 1.0, %v891_v40  ;;  %vm912_vm13 = vmor %vm910_vm11, %vm911_vm9  ;;  %v934_v30 = vand.u32 2147483647, %v924_v22  ;;  %v937_v43 = vor.u32 1.1754944e-38, %v936_v29 }
 0x245   : > { %v907_v53 = vsub.f32 1.0, %v906_v41 }
 0x246   : > { %v893_v60 = vmul.f32 %v1635_v25, %v892_v52  ;;  %vm935_vm3 = vcmp.eq.f32.partialorder %v934_v30, 8.507059e+37 }
 0x247   : > { %v908_v63 = vmul.f32 %v1637_v36, %v907_v53 }
 0x248   : > { %v1639_v1 = vpop.eup %1638  ;;  %v894_v2 = vadd.f32 %v1635_v25, %v893_v60 }
 0x249   : > { %v909_v4 = vadd.f32 %v1637_v36, %v908_v63  ;;  %v926_v7 = vmul.f32 %v1639_v1, %v924_v22  ;;  %v1641_v12 = vpop.eup %1640  ;;  %vm931_vm0 = vweird.f32 %v1639_v1 }
 0x24a   : > { %v898_v11 = vsel %vm897_vm12, %v1635_v25, %v894_v2  ;;  %vm932_vm2 = vmor %vm930_vm1, %vm931_vm0 }
 0x24b   : > { %v903_v13 = vsel %vm900_vm14, %v902_v3, %v898_v11  ;;  %v913_v14 = vsel %vm912_vm13, %v1637_v36, %v909_v4  ;;  %v927_v15 = vsub.f32 1.0, %v926_v7 }
 0x24c   : > { %v918_v16 = vsel %vm915_vm15, %v917_v8, %v913_v14  ;;  %v941_v20 = vmul.f32 %v1641_v12, %v903_v13 }
 0x24d   : > { %v940_v21 = vmul.f32 %v918_v16, %v2140_v34  ;;  %v928_v26 = vmul.f32 %v1639_v1, %v927_v15 }
 0x24f   : > { %v2152_v27 = vadd.f32 %v941_v20, %v940_v21  ;;  %v929_v31 = vadd.f32 %v1639_v1, %v928_v26 }
 0x251   : > { %1642 = vtanh.f32 %v2152_v27  ;;  %v933_v39 = vsel %vm932_vm2, %v1639_v1, %v929_v31 }
 0x252   : > { %v938_v34 = vsel %vm935_vm3, %v937_v43, %v933_v39 }
 0x257   : > { %v1643_v45 = vpop.eup %1642 }
 0x258   : > { %v944_v38 = vmul.f32 %v1643_v45, %v938_v34 }
 0x25a   : > { %947 = vst [vmem:[%s946_s8] sm:$0xff] %v944_v38  ;;  %v957_v47 = vpack.c.bf16 %v944_v38, %v944_v38 }
 0x25c   : > { %966 = vmatmul.bf16.vlgmr.msrb.gmra.mxu0 %v957_v47  ;;  %979 = vmatmul.bf16.vlgmr.msrb.gmra.mxu1 %v957_v47 }
 0x25d   : > { %992 = vmatmul.bf16.vlgmr.msrb.gmra.mxu2 %v957_v47  ;;  %1005 = vmatmul.bf16.vlgmr.msrb.gmra.mxu3 %v957_v47 }
 0x2d9   : > { %v967_v56 = vpop.f32.mrf.mxu0  ;;  %v980_v59 = vpop.f32.mrf.mxu1 }
 0x2da   : > { %v1010_v19 = vadd.f32 %v1494_v46, %v967_v56  ;;  %v1011_v23 = vadd.f32 %v1495_v51, %v980_v59 }
 0x2dc   : > { %v1498_v24 = vmul.f32 -1.442695, %v1010_v19  ;;  %v1499_v28 = vmul.f32 -1.442695, %v1011_v23 }
 0x2de   : > { %1644 = vpow2.f32 %v1498_v24 }
 0x2df   : > { %1646 = vpow2.f32 %v1499_v28 }
 0x2e0   : > { %v993_v33 = vpop.f32.mrf.mxu2  ;;  %v1006_v37 = vpop.f32.mrf.mxu3 }
 0x2e1   : > { %v1013_v44 = vadd.f32 %v1497_v32, %v1006_v37  ;;  %v969_v48 = vpop.f32.mrf.mxu0  ;;  %v982_v49 = vpop.f32.mrf.mxu1  ;;  %v1012_v22 = vadd.f32 %v1496_v9, %v993_v33 }
 0x2e3   : > { %v1500_v50 = vmul.f32 -1.442695, %v1013_v44 }
 0x2e4   : > { %v1645_v57 = vpop.eup %1644 }
 0x2e5   : > { %v1647_v58 = vpop.eup %1646  ;;  %v1020_v61 = vadd.f32 1.0, %v1645_v57  ;;  %1648 = vpow2.f32 %v1500_v50 }
 0x2e6   : > { %v1021_v62 = vadd.f32 1.0, %v1647_v58 }
 0x2e7   : > { %1650 = vrcp.f32 %v1020_v61  ;;  %v1033_v52 = vand.u32 2147483648, %v1020_v61  ;;  %v1031_v55 = vand.u32 2147483647, %v1020_v61  ;;  %vm1027_vm6 = vweird.f32 %v1020_v61 }
 0x2e8   : > { %1652 = vrcp.f32 %v1021_v62  ;;  %v995_v5 = vpop.f32.mrf.mxu2  ;;  %v1008_v6 = vpop.f32.mrf.mxu3  ;;  %v1048_v53 = vand.u32 2147483648, %v1021_v62  ;;  %v1046_v42 = vand.u32 2147483647, %v1021_v62  ;;  %vm1042_vm7 = vweird.f32 %v1021_v62 }
 0x2e9   : > { %v1034_v1 = vor.u32 1.1754944e-38, %v1033_v52  ;;  %vm1032_vm10 = vcmp.eq.f32.partialorder %v1031_v55, 8.507059e+37 }
 0x2ea   : > { %v1049_v4 = vor.u32 1.1754944e-38, %v1048_v53  ;;  %vm1047_vm11 = vcmp.eq.f32.partialorder %v1046_v42, 8.507059e+37 }
 0x2eb   : > { %v1649_v10 = vpop.eup %1648 }
 0x2ec   : > { %v1056_v17 = vadd.f32 1.0, %v1649_v10 }
 0x2ed   : > { %v1651_v18 = vpop.eup %1650 }
 0x2ee   : > { %v1653_v25 = vpop.eup %1652  ;;  %v1023_v35 = vmul.f32 %v1651_v18, %v1020_v61  ;;  %1654 = vrcp.f32 %v1056_v17  ;;  %vm1028_vm4 = vweird.f32 %v1651_v18  ;;  %v1068_v31 = vand.u32 2147483648, %v1056_v17 }
 0x2ef   : > { %v1038_v36 = vmul.f32 %v1653_v25, %v1021_v62  ;;  %1656 = vtanh.f32 %v1012_v22  ;;  %vm1043_vm5 = vweird.f32 %v1653_v25  ;;  %vm1029_vm8 = vmor %vm1027_vm6, %vm1028_vm4  ;;  %vm1062_vm13 = vweird.f32 %v1056_v17 }
 0x2f0   : > { %v1024_v40 = vsub.f32 1.0, %v1023_v35  ;;  %vm1044_vm9 = vmor %vm1042_vm7, %vm1043_vm5  ;;  %v1066_v29 = vand.u32 2147483647, %v1056_v17  ;;  %v1069_v39 = vor.u32 1.1754944e-38, %v1068_v31 }
 0x2f1   : > { %v1039_v41 = vsub.f32 1.0, %v1038_v36 }
 0x2f2   : > { %v1025_v54 = vmul.f32 %v1651_v18, %v1024_v40  ;;  %vm1067_vm15 = vcmp.eq.f32.partialorder %v1066_v29, 8.507059e+37 }
 0x2f3   : > { %v1040_v60 = vmul.f32 %v1653_v25, %v1039_v41 }
 0x2f4   : > { %v1655_v63 = vpop.eup %1654  ;;  %v1026_v0 = vadd.f32 %v1651_v18, %v1025_v54 }
 0x2f5   : > { %v1041_v2 = vadd.f32 %v1653_v25, %v1040_v60  ;;  %v1058_v3 = vmul.f32 %v1655_v63, %v1056_v17  ;;  %v1657_v8 = vpop.eup %1656  ;;  %vm1063_vm12 = vweird.f32 %v1655_v63 }
 0x2f6   : > { %v1030_v7 = vsel %vm1029_vm8, %v1651_v18, %v1026_v0  ;;  %vm1064_vm14 = vmor %vm1062_vm13, %vm1063_vm12 }
 0x2f7   : > { %v1035_v11 = vsel %vm1032_vm10, %v1034_v1, %v1030_v7  ;;  %v1045_v12 = vsel %vm1044_vm9, %v1653_v25, %v1041_v2  ;;  %v1059_v13 = vsub.f32 1.0, %v1058_v3 }
 0x2f8   : > { %v1050_v14 = vsel %vm1047_vm11, %v1049_v4, %v1045_v12  ;;  %v1073_v15 = vmul.f32 %v1657_v8, %v1035_v11 }
 0x2f9   : > { %v1072_v16 = vmul.f32 %v1050_v14, %v2152_v27  ;;  %v1060_v20 = vmul.f32 %v1655_v63, %v1059_v13 }
 0x2fb   : > { %v1074_v21 = vadd.f32 %v1073_v15, %v1072_v16  ;;  %v1061_v26 = vadd.f32 %v1655_v63, %v1060_v20 }
 0x2fd   : > { %1658 = vtanh.f32 %v1074_v21  ;;  %1086 = vst [vmem:[%s354_s13] sm:$0xff] %v1074_v21  ;;  %v1065_v30 = vsel %vm1064_vm14, %v1655_v63, %v1061_v26 }
 0x2fe   : > { %v1070_v43 = vsel %vm1067_vm15, %v1069_v39, %v1065_v30 }
 0x303   : > { %v1659_v27 = vpop.eup %1658  ;;  %1101 = sbr.rel (!%p1818_p9) target bundleno = 786 (0x312), region = 67 }
 0x304   : > { %v1076_v45 = vmul.f32 %v1659_v27, %v1070_v43 }
 0x306   : > { %1502 = vst [vmem:[%s1244_s21 + $0x18] sm:$0xff] %v1076_v45 }
 0x307   : > { %1085 = vst [vmem:[%s350_s30] sm:$0xff] %v1076_v45 }
 0x30d   : > { %v1145_v34 = vld [vmem:[%s2102_s14] sm:$0xff]  ;;  %v1147_v38 = vld [vmem:[%s2102_s14 + $0x8] sm:$0xff]  ;;  %v1149_v47 = vld [vmem:[%s2102_s14 + $0x10] sm:$0xff] }
 0x30e   : > { %1146 = vst [vmem:[%s1110_s7] sm:$0xff] %v1145_v34  ;;  %v1151_v46 = vld [vmem:[%s2102_s14 + $0x18] sm:$0xff] }
 0x30f   : > { %1148 = vst [vmem:[%s1110_s7 + $0x10] sm:$0xff] %v1147_v38 }
 0x310   : > { %1150 = vst [vmem:[%s1110_s7 + $0x20] sm:$0xff] %v1149_v47 }
 0x311   : > { %1152 = vst [vmem:[%s1110_s7 + $0x30] sm:$0xff] %v1151_v46 }
 0x312 PF: > { %s18_s20 = sadd.s32 1, %s1738_s20   ;;  %s2211_s15 = smov %s1722_s16 }
 0x313   : > { %p15_p1 = scmp.ge.s32.totalorder %s18_s20, 4   ;;  %s2212_s16 = smov %s1726_s17 }
 0x314   : > { %s2213_s17 = smov %s1816_s27  ;;  %s2214_s18 = smov %s1734_s19 }
 0x315   : > { %s2215_s19 = smov %s2217_s22  ;;  %17 = sbr.rel (!%p15_p1) target bundleno = 4 (0x4), region = 177 }
 0x31a   :  { %1188 = vsyncpa [#allocation6], 1 }
 0x31b   :  { %1190 = vsyncpa [#allocation6 + $0x1], 1 }

// kernel: pblstm_forward.2
= control target key start
LH: loop header
LB: loop body
LE: loop exit
PB: predicated region body
PF: predicated region fallthrough
CT: control target
= control target key end

     0   :  { %8 = vsyncpa [#allocation3], 0  ;;  %s996_s15 = smov [#allocation2]   ;;  %s997_s17 = smov 512   ;;  %s1147_s0 = inlined_call_operand.vmem [shape: bf16[32,128], index: 0, kind: input, shape index: {}]   ;;  %s1148_s1 = inlined_call_operand.hbm [shape: bf16[128,1024], index: 1, kind: input, shape index: {}]   ;;  %s1149_s2 = inlined_call_operand.vmem [shape: f32[1,1024], index: 2, kind: input, shape index: {}]   ;;  %s1150_s3 = inlined_call_operand.vmem [shape: f32[32,1024], index: 3, kind: output, shape index: {}]  }
   0x1   :  { %s15_s14 = sshll.u32 %s1148_s1, 4  ;;  %s17_s16 = sshll.u32 %s996_s15, 4  ;;  %s16_s14 = int_to_ptr.hbm [resolvable:$true] %s15_s14  ;;  %s18_s16 = int_to_ptr.vmem [resolvable:$true] %s17_s16 }
   0x2   :  { %s998_s18 = smov 32  }
   0x3   :  { %23 = dma.hbm_to_vmem [thread:$0]  %s16_s14, 8192, %s18_s16, [#allocation3], %s997_s17, %s997_s17, %s998_s18  }
   0x4   :  { %994 = dma.done.wait [#allocation3], 8192  }
   0x5   :  { %995 = vsyncadd [#allocation3], 4294959104  ;;  %v871_v0 = vld [vmem:[#allocation2 + $0x1c0] sm:$0xf]  ;;  %v959_v2 = vld [vmem:[#allocation2 + $0x1c4] sm:$0xf] }
   0x6   :  { %v963_v1 = vld [vmem:[#allocation2 + $0x1dc] sm:$0xf0]  ;;  %v873_v4 = vld [vmem:[#allocation2 + $0x1e0] sm:$0xf0]  ;;  %v879_v5 = vld [vmem:[#allocation2 + $0x1c8] sm:$0xf] }
   0x7   :  { %v872_v3 = vor.u32 %v963_v1, %v871_v0  ;;  %v964_v6 = vld [vmem:[#allocation2 + $0x1e4] sm:$0xf0]  ;;  %v876_v7 = vor.u32 %v959_v2, %v873_v4  ;;  %v960_v9 = vld [vmem:[#allocation2 + $0x1cc] sm:$0xf]  ;;  %v839_v11 = vld [vmem:[#allocation2 + $0x180] sm:$0xf] }
   0x8   :  { %v880_v8 = vor.u32 %v964_v6, %v879_v5  ;;  %v881_v10 = vld [vmem:[#allocation2 + $0x1e8] sm:$0xf0]  ;;  %v955_v13 = vld [vmem:[#allocation2 + $0x19c] sm:$0xf0]  ;;  %v951_v14 = vld [vmem:[#allocation2 + $0x184] sm:$0xf] }
   0x9   :  { %448 = vmatpush.bf16.msra.mxu0 %v872_v3  ;;  %v884_v12 = vor.u32 %v960_v9, %v881_v10  ;;  %v841_v15 = vld [vmem:[#allocation2 + $0x1a0] sm:$0xf0]  ;;  %467 = vmatpush.bf16.msra.mxu1 %v876_v7  ;;  %v840_v16 = vor.u32 %v955_v13, %v839_v11  ;;  %v847_v18 = vld [vmem:[#allocation2 + $0x188] sm:$0xf]  ;;  %v952_v20 = vld [vmem:[#allocation2 + $0x18c] sm:$0xf] }
   0xa   :  { %486 = vmatpush.bf16.msra.mxu2 %v880_v8  ;;  %v844_v17 = vor.u32 %v951_v14, %v841_v15  ;;  %v956_v19 = vld [vmem:[#allocation2 + $0x1a4] sm:$0xf0]  ;;  %v849_v22 = vld [vmem:[#allocation2 + $0x1a8] sm:$0xf0]  ;;  %v807_v23 = vld [vmem:[#allocation2 + $0x140] sm:$0xf] }
   0xb   :  { %505 = vmatpush.bf16.msra.mxu3 %v884_v12  ;;  %v848_v21 = vor.u32 %v956_v19, %v847_v18  ;;  %v947_v24 = vld [vmem:[#allocation2 + $0x15c] sm:$0xf0]  ;;  %v852_v25 = vor.u32 %v952_v20, %v849_v22  ;;  %v943_v26 = vld [vmem:[#allocation2 + $0x144] sm:$0xf]  ;;  %v815_v28 = vld [vmem:[#allocation2 + $0x148] sm:$0xf] }
   0xc   :  { %v809_v27 = vld [vmem:[#allocation2 + $0x160] sm:$0xf0]  ;;  %v808_v29 = vor.u32 %v947_v24, %v807_v23  ;;  %v948_v30 = vld [vmem:[#allocation2 + $0x164] sm:$0xf0]  ;;  %v944_v31 = vld [vmem:[#allocation2 + $0x14c] sm:$0xf] }
   0xd   :  { %449 = vmatpush.bf16.msra.mxu0 %v840_v16  ;;  %v817_v32 = vld [vmem:[#allocation2 + $0x168] sm:$0xf0]  ;;  %468 = vmatpush.bf16.msra.mxu1 %v844_v17  ;;  %v812_v33 = vor.u32 %v943_v26, %v809_v27  ;;  %v816_v34 = vor.u32 %v948_v30, %v815_v28  ;;  %v775_v35 = vld [vmem:[#allocation2 + $0x100] sm:$0xf]  ;;  %v935_v37 = vld [vmem:[#allocation2 + $0x104] sm:$0xf] }
   0xe   :  { %487 = vmatpush.bf16.msra.mxu2 %v848_v21  ;;  %v939_v36 = vld [vmem:[#allocation2 + $0x11c] sm:$0xf0]  ;;  %v820_v38 = vor.u32 %v944_v31, %v817_v32  ;;  %v777_v39 = vld [vmem:[#allocation2 + $0x120] sm:$0xf0]  ;;  %v783_v40 = vld [vmem:[#allocation2 + $0x108] sm:$0xf] }
   0xf   :  { %506 = vmatpush.bf16.msra.mxu3 %v852_v25  ;;  %v940_v41 = vld [vmem:[#allocation2 + $0x124] sm:$0xf0]  ;;  %v936_v42 = vld [vmem:[#allocation2 + $0x10c] sm:$0xf]  ;;  %v776_v44 = vor.u32 %v939_v36, %v775_v35  ;;  %v780_v45 = vor.u32 %v935_v37, %v777_v39  ;;  %v743_v47 = vld [vmem:[#allocation2 + $0xc0] sm:$0xf] }
  0x10   :  { %v785_v43 = vld [vmem:[#allocation2 + $0x128] sm:$0xf0]  ;;  %v784_v46 = vor.u32 %v940_v41, %v783_v40  ;;  %v931_v48 = vld [vmem:[#allocation2 + $0xdc] sm:$0xf0]  ;;  %v927_v49 = vld [vmem:[#allocation2 + $0xc4] sm:$0xf] }
  0x11   :  { %450 = vmatpush.bf16.msra.mxu0 %v808_v29  ;;  %469 = vmatpush.bf16.msra.mxu1 %v812_v33  ;;  %v788_v50 = vor.u32 %v936_v42, %v785_v43  ;;  %v745_v51 = vld [vmem:[#allocation2 + $0xe0] sm:$0xf0]  ;;  %v751_v52 = vld [vmem:[#allocation2 + $0xc8] sm:$0xf]  ;;  %v928_v54 = vld [vmem:[#allocation2 + $0xcc] sm:$0xf]  ;;  %v744_v56 = vor.u32 %v931_v48, %v743_v47 }
  0x12   :  { %488 = vmatpush.bf16.msra.mxu2 %v816_v34  ;;  %v932_v53 = vld [vmem:[#allocation2 + $0xe4] sm:$0xf0]  ;;  %v753_v55 = vld [vmem:[#allocation2 + $0xe8] sm:$0xf0]  ;;  %v748_v57 = vor.u32 %v927_v49, %v745_v51  ;;  %v711_v59 = vld [vmem:[#allocation2 + $0x80] sm:$0xf] }
  0x13   :  { %507 = vmatpush.bf16.msra.mxu3 %v820_v38  ;;  %v752_v58 = vor.u32 %v932_v53, %v751_v52  ;;  %v923_v60 = vld [vmem:[#allocation2 + $0x9c] sm:$0xf0]  ;;  %v919_v61 = vld [vmem:[#allocation2 + $0x84] sm:$0xf]  ;;  %v756_v62 = vor.u32 %v928_v54, %v753_v55  ;;  %v719_v0 = vld [vmem:[#allocation2 + $0x88] sm:$0xf] }
  0x14   :  { %v713_v63 = vld [vmem:[#allocation2 + $0xa0] sm:$0xf0]  ;;  %v924_v1 = vld [vmem:[#allocation2 + $0xa4] sm:$0xf0]  ;;  %v920_v2 = vld [vmem:[#allocation2 + $0x8c] sm:$0xf]  ;;  %v712_v4 = vor.u32 %v923_v60, %v711_v59 }
  0x15   :  { %451 = vmatpush.bf16.msra.mxu0 %v776_v44  ;;  %470 = vmatpush.bf16.msra.mxu1 %v780_v45  ;;  %v721_v3 = vld [vmem:[#allocation2 + $0xa8] sm:$0xf0]  ;;  %v716_v5 = vor.u32 %v919_v61, %v713_v63  ;;  %v720_v6 = vor.u32 %v924_v1, %v719_v0  ;;  %v679_v7 = vld [vmem:[#allocation2 + $0x40] sm:$0xf]  ;;  %v911_v9 = vld [vmem:[#allocation2 + $0x44] sm:$0xf] }
  0x16   :  { %489 = vmatpush.bf16.msra.mxu2 %v784_v46  ;;  %v915_v8 = vld [vmem:[#allocation2 + $0x5c] sm:$0xf0]  ;;  %v724_v10 = vor.u32 %v920_v2, %v721_v3  ;;  %v681_v11 = vld [vmem:[#allocation2 + $0x60] sm:$0xf0]  ;;  %v687_v12 = vld [vmem:[#allocation2 + $0x48] sm:$0xf] }
  0x17   :  { %508 = vmatpush.bf16.msra.mxu3 %v788_v50  ;;  %v916_v13 = vld [vmem:[#allocation2 + $0x64] sm:$0xf0]  ;;  %v912_v14 = vld [vmem:[#allocation2 + $0x4c] sm:$0xf]  ;;  %v680_v16 = vor.u32 %v915_v8, %v679_v7  ;;  %v647_v17 = vld [vmem:[#allocation2] sm:$0xf]  ;;  %v684_v18 = vor.u32 %v911_v9, %v681_v11 }
  0x18   :  { %v689_v15 = vld [vmem:[#allocation2 + $0x68] sm:$0xf0]  ;;  %v688_v19 = vor.u32 %v916_v13, %v687_v12  ;;  %v907_v20 = vld [vmem:[#allocation2 + $0x1c] sm:$0xf0]  ;;  %v903_v21 = vld [vmem:[#allocation2 + $0x4] sm:$0xf] }
  0x19   :  { %452 = vmatpush.bf16.msra.mxu0 %v744_v56  ;;  %471 = vmatpush.bf16.msra.mxu1 %v748_v57  ;;  %v649_v22 = vld [vmem:[#allocation2 + $0x20] sm:$0xf0]  ;;  %v692_v23 = vor.u32 %v912_v14, %v689_v15  ;;  %v655_v24 = vld [vmem:[#allocation2 + $0x8] sm:$0xf]  ;;  %v904_v26 = vld [vmem:[#allocation2 + $0xc] sm:$0xf]  ;;  %v648_v30 = vor.u32 %v907_v20, %v647_v17 }
  0x1a   :  { %490 = vmatpush.bf16.msra.mxu2 %v752_v58  ;;  %v908_v25 = vld [vmem:[#allocation2 + $0x24] sm:$0xf0]  ;;  %v657_v27 = vld [vmem:[#allocation2 + $0x28] sm:$0xf0]  ;;  %v895_v28 = vld [vmem:[#allocation2 + $0x1d8] sm:$0xf]  ;;  %v652_v33 = vor.u32 %v903_v21, %v649_v22 }
  0x1b   :  { %509 = vmatpush.bf16.msra.mxu3 %v756_v62  ;;  %v966_v29 = vld [vmem:[#allocation2 + $0x1f4] sm:$0xf0]  ;;  %v962_v31 = vld [vmem:[#allocation2 + $0x1dc] sm:$0xf]  ;;  %v656_v34 = vor.u32 %v908_v25, %v655_v24  ;;  %v1025_v35 = vld [vmem:[%s1147_s0] sm:$0xff]  ;;  %v660_v36 = vor.u32 %v904_v26, %v657_v27 }
  0x1c   :  { %v897_v32 = vld [vmem:[#allocation2 + $0x1f8] sm:$0xf0]  ;;  %v896_v37 = vor.u32 %v966_v29, %v895_v28  ;;  %v887_v38 = vld [vmem:[#allocation2 + $0x1d0] sm:$0xf]  ;;  %v961_v40 = vld [vmem:[#allocation2 + $0x1d4] sm:$0xf] }
  0x1d   :  { %453 = vmatpush.bf16.msra.mxu0 %v712_v4  ;;  %472 = vmatpush.bf16.msra.mxu1 %v716_v5  ;;  %v965_v39 = vld [vmem:[#allocation2 + $0x1ec] sm:$0xf0]  ;;  %v900_v41 = vor.u32 %v962_v31, %v897_v32  ;;  %v889_v42 = vld [vmem:[#allocation2 + $0x1f0] sm:$0xf0]  ;;  %v863_v43 = vld [vmem:[#allocation2 + $0x198] sm:$0xf] }
  0x1e   :  { %491 = vmatpush.bf16.msra.mxu2 %v720_v6  ;;  %v958_v44 = vld [vmem:[#allocation2 + $0x1b4] sm:$0xf0]  ;;  %v954_v45 = vld [vmem:[#allocation2 + $0x19c] sm:$0xf]  ;;  %v888_v47 = vor.u32 %v965_v39, %v887_v38  ;;  %v892_v48 = vor.u32 %v961_v40, %v889_v42  ;;  %v855_v50 = vld [vmem:[#allocation2 + $0x190] sm:$0xf] }
  0x1f   :  { %510 = vmatpush.bf16.msra.mxu3 %v724_v10  ;;  %v865_v46 = vld [vmem:[#allocation2 + $0x1b8] sm:$0xf0]  ;;  %v864_v49 = vor.u32 %v958_v44, %v863_v43  ;;  %v957_v51 = vld [vmem:[#allocation2 + $0x1ac] sm:$0xf0]  ;;  %v953_v52 = vld [vmem:[#allocation2 + $0x194] sm:$0xf] }
  0x20   :  { %v868_v53 = vor.u32 %v954_v45, %v865_v46  ;;  %v857_v54 = vld [vmem:[#allocation2 + $0x1b0] sm:$0xf0]  ;;  %v831_v55 = vld [vmem:[#allocation2 + $0x158] sm:$0xf]  ;;  %v946_v57 = vld [vmem:[#allocation2 + $0x15c] sm:$0xf]  ;;  %v856_v59 = vor.u32 %v957_v51, %v855_v50 }
  0x21   :  { %454 = vmatpush.bf16.msra.mxu0 %v680_v16  ;;  %473 = vmatpush.bf16.msra.mxu1 %v684_v18  ;;  %v950_v56 = vld [vmem:[#allocation2 + $0x174] sm:$0xf0]  ;;  %v833_v58 = vld [vmem:[#allocation2 + $0x178] sm:$0xf0]  ;;  %v860_v60 = vor.u32 %v953_v52, %v857_v54  ;;  %v823_v62 = vld [vmem:[#allocation2 + $0x150] sm:$0xf] }
  0x22   :  { %492 = vmatpush.bf16.msra.mxu2 %v688_v19  ;;  %v832_v61 = vor.u32 %v950_v56, %v831_v55  ;;  %v949_v63 = vld [vmem:[#allocation2 + $0x16c] sm:$0xf0]  ;;  %v945_v0 = vld [vmem:[#allocation2 + $0x154] sm:$0xf]  ;;  %v836_v1 = vor.u32 %v946_v57, %v833_v58  ;;  %v799_v3 = vld [vmem:[#allocation2 + $0x118] sm:$0xf] }
  0x23   :  { %511 = vmatpush.bf16.msra.mxu3 %v692_v23  ;;  %v825_v2 = vld [vmem:[#allocation2 + $0x170] sm:$0xf0]  ;;  %v942_v4 = vld [vmem:[#allocation2 + $0x134] sm:$0xf0]  ;;  %v938_v5 = vld [vmem:[#allocation2 + $0x11c] sm:$0xf]  ;;  %v824_v7 = vor.u32 %v949_v63, %v823_v62 }
  0x24   :  { %v801_v6 = vld [vmem:[#allocation2 + $0x138] sm:$0xf0]  ;;  %v828_v8 = vor.u32 %v945_v0, %v825_v2  ;;  %v800_v9 = vor.u32 %v942_v4, %v799_v3  ;;  %v791_v10 = vld [vmem:[#allocation2 + $0x110] sm:$0xf]  ;;  %v937_v12 = vld [vmem:[#allocation2 + $0x114] sm:$0xf] }
  0x25   :  { %455 = vmatpush.bf16.msra.mxu0 %v648_v30  ;;  %474 = vmatpush.bf16.msra.mxu1 %v652_v33  ;;  %v941_v11 = vld [vmem:[#allocation2 + $0x12c] sm:$0xf0]  ;;  %v804_v13 = vor.u32 %v938_v5, %v801_v6  ;;  %v793_v14 = vld [vmem:[#allocation2 + $0x130] sm:$0xf0]  ;;  %v767_v15 = vld [vmem:[#allocation2 + $0xd8] sm:$0xf] }
  0x26   :  { %493 = vmatpush.bf16.msra.mxu2 %v656_v34  ;;  %v934_v16 = vld [vmem:[#allocation2 + $0xf4] sm:$0xf0]  ;;  %v930_v17 = vld [vmem:[#allocation2 + $0xdc] sm:$0xf]  ;;  %v792_v19 = vor.u32 %v941_v11, %v791_v10  ;;  %v1034_v20 = vld [vmem:[%s1147_s0 + $0x8] sm:$0xff]  ;;  %v796_v21 = vor.u32 %v937_v12, %v793_v14 }
  0x27   :  { %512 = vmatpush.bf16.msra.mxu3 %v660_v36  ;;  %v769_v18 = vld [vmem:[#allocation2 + $0xf8] sm:$0xf0]  ;;  %v768_v22 = vor.u32 %v934_v16, %v767_v15  ;;  %v759_v23 = vld [vmem:[#allocation2 + $0xd0] sm:$0xf]  ;;  %v929_v25 = vld [vmem:[#allocation2 + $0xd4] sm:$0xf] }
  0x28   :  { %456 = vmatmul.bf16.vlgmr.msra.gmra.mxu0 %v1025_v35  ;;  %475 = vmatmul.bf16.vlgmr.msra.gmra.mxu1 %v1025_v35  ;;  %v933_v24 = vld [vmem:[#allocation2 + $0xec] sm:$0xf0]  ;;  %v772_v26 = vor.u32 %v930_v17, %v769_v18  ;;  %v761_v27 = vld [vmem:[#allocation2 + $0xf0] sm:$0xf0]  ;;  %v735_v28 = vld [vmem:[#allocation2 + $0x98] sm:$0xf] }
  0x29   :  { %494 = vmatmul.bf16.vlgmr.msra.gmra.mxu2 %v1025_v35  ;;  %524 = vmatpush.bf16.msrb.mxu0 %v888_v47  ;;  %v926_v29 = vld [vmem:[#allocation2 + $0xb4] sm:$0xf0]  ;;  %v922_v30 = vld [vmem:[#allocation2 + $0x9c] sm:$0xf]  ;;  %v760_v32 = vor.u32 %v933_v24, %v759_v23  ;;  %v764_v33 = vor.u32 %v929_v25, %v761_v27  ;;  %v727_v36 = vld [vmem:[#allocation2 + $0x90] sm:$0xf] }
  0x2a   :  { %562 = vmatpush.bf16.msrb.mxu2 %v896_v37  ;;  %513 = vmatmul.bf16.vlgmr.msra.gmra.mxu3 %v1025_v35  ;;  %v737_v31 = vld [vmem:[#allocation2 + $0xb8] sm:$0xf0]  ;;  %v736_v34 = vor.u32 %v926_v29, %v735_v28  ;;  %v925_v37 = vld [vmem:[#allocation2 + $0xac] sm:$0xf0]  ;;  %v921_v38 = vld [vmem:[#allocation2 + $0x94] sm:$0xf] }
  0x2b   :  { %581 = vmatpush.bf16.msrb.mxu3 %v900_v41  ;;  %543 = vmatpush.bf16.msrb.mxu1 %v892_v48  ;;  %v740_v39 = vor.u32 %v922_v30, %v737_v31  ;;  %v729_v40 = vld [vmem:[#allocation2 + $0xb0] sm:$0xf0]  ;;  %v703_v41 = vld [vmem:[#allocation2 + $0x58] sm:$0xf]  ;;  %v914_v43 = vld [vmem:[#allocation2 + $0x5c] sm:$0xf]  ;;  %v728_v45 = vor.u32 %v925_v37, %v727_v36 }
  0x2c   :  { %v918_v42 = vld [vmem:[#allocation2 + $0x74] sm:$0xf0]  ;;  %v705_v44 = vld [vmem:[#allocation2 + $0x78] sm:$0xf0]  ;;  %v732_v46 = vor.u32 %v921_v38, %v729_v40  ;;  %v695_v48 = vld [vmem:[#allocation2 + $0x50] sm:$0xf] }
  0x2d   :  { %525 = vmatpush.bf16.msrb.mxu0 %v856_v59  ;;  %v704_v47 = vor.u32 %v918_v42, %v703_v41  ;;  %v913_v50 = vld [vmem:[#allocation2 + $0x54] sm:$0xf]  ;;  %v708_v51 = vor.u32 %v914_v43, %v705_v44  ;;  %v910_v54 = vld [vmem:[#allocation2 + $0x34] sm:$0xf0]  ;;  %v906_v55 = vld [vmem:[#allocation2 + $0x1c] sm:$0xf] }
  0x2e   :  { %563 = vmatpush.bf16.msrb.mxu2 %v864_v49  ;;  %v917_v49 = vld [vmem:[#allocation2 + $0x6c] sm:$0xf0]  ;;  %v697_v52 = vld [vmem:[#allocation2 + $0x70] sm:$0xf0]  ;;  %v673_v56 = vld [vmem:[#allocation2 + $0x38] sm:$0xf0] }
  0x2f   :  { %582 = vmatpush.bf16.msrb.mxu3 %v868_v53  ;;  %544 = vmatpush.bf16.msrb.mxu1 %v860_v60  ;;  %v671_v53 = vld [vmem:[#allocation2 + $0x18] sm:$0xf]  ;;  %v696_v57 = vor.u32 %v917_v49, %v695_v48  ;;  %v700_v58 = vor.u32 %v913_v50, %v697_v52  ;;  %v663_v60 = vld [vmem:[#allocation2 + $0x10] sm:$0xf]  ;;  %v676_v62 = vor.u32 %v906_v55, %v673_v56  ;;  %v905_v63 = vld [vmem:[#allocation2 + $0x14] sm:$0xf] }
  0x30   :  { %v672_v59 = vor.u32 %v910_v54, %v671_v53  ;;  %v665_v0 = vld [vmem:[#allocation2 + $0x30] sm:$0xf0]  ;;  %v98_v3 = vld [vmem:[%s1149_s2] sm:$0xff] }
  0x31   :  { %526 = vmatpush.bf16.msrb.mxu0 %v824_v7  ;;  %v668_v2 = vor.u32 %v905_v63, %v665_v0  ;;  %v100_v4 = vperm.slane %v98_v3, 0  ;;  %v101_v5 = vperm.slane %v98_v3, 1  ;;  %v103_v10 = vperm.slane %v98_v3, 3 }
  0x32   :  { %564 = vmatpush.bf16.msrb.mxu2 %v832_v61  ;;  %v909_v61 = vld [vmem:[#allocation2 + $0x2c] sm:$0xf0]  ;;  %v104_v36 = vperm.slane %v98_v3, 4  ;;  %v105_v38 = vperm.slane %v98_v3, 5 }
  0x33   :  { %583 = vmatpush.bf16.msrb.mxu3 %v836_v1  ;;  %545 = vmatpush.bf16.msrb.mxu1 %v828_v8  ;;  %v664_v1 = vor.u32 %v909_v61, %v663_v60 }
  0x35   :  { %527 = vmatpush.bf16.msrb.mxu0 %v792_v19 }
  0x36   :  { %565 = vmatpush.bf16.msrb.mxu2 %v800_v9 }
  0x37   :  { %584 = vmatpush.bf16.msrb.mxu3 %v804_v13  ;;  %546 = vmatpush.bf16.msrb.mxu1 %v796_v21 }
  0x38   :  { %461 = vmatmul.bf16.gmra.mxu0 %v1034_v20  ;;  %480 = vmatmul.bf16.gmra.mxu1 %v1034_v20 }
  0x39   :  { %499 = vmatmul.bf16.gmra.mxu2 %v1034_v20  ;;  %528 = vmatpush.bf16.msrb.mxu0 %v760_v32 }
  0x3a   :  { %566 = vmatpush.bf16.msrb.mxu2 %v768_v22  ;;  %518 = vmatmul.bf16.gmra.mxu3 %v1034_v20 }
  0x3b   :  { %585 = vmatpush.bf16.msrb.mxu3 %v772_v26  ;;  %547 = vmatpush.bf16.msrb.mxu1 %v764_v33 }
  0x3d   :  { %529 = vmatpush.bf16.msrb.mxu0 %v728_v45 }
  0x3e   :  { %567 = vmatpush.bf16.msrb.mxu2 %v736_v34 }
  0x3f   :  { %586 = vmatpush.bf16.msrb.mxu3 %v740_v39  ;;  %548 = vmatpush.bf16.msrb.mxu1 %v732_v46  ;;  %v106_v46 = vperm.slane %v98_v3, 6 }
  0x41   :  { %530 = vmatpush.bf16.msrb.mxu0 %v696_v57 }
  0x42   :  { %568 = vmatpush.bf16.msrb.mxu2 %v704_v47  ;;  %v107_v47 = vperm.slane %v98_v3, 7 }
  0x43   :  { %587 = vmatpush.bf16.msrb.mxu3 %v708_v51  ;;  %549 = vmatpush.bf16.msrb.mxu1 %v700_v58 }
  0x45   :  { %531 = vmatpush.bf16.msrb.mxu0 %v664_v1 }
  0x46   :  { %569 = vmatpush.bf16.msrb.mxu2 %v672_v59 }
  0x47   :  { %588 = vmatpush.bf16.msrb.mxu3 %v676_v62  ;;  %550 = vmatpush.bf16.msrb.mxu1 %v668_v2 }
  0x48   :  { %532 = vmatmul.bf16.vlgmr.msrb.gmra.mxu0 %v1025_v35 }
  0x49   :  { %570 = vmatmul.bf16.vlgmr.msrb.gmra.mxu2 %v1025_v35 }
  0x4a   :  { %551 = vmatmul.bf16.vlgmr.msrb.gmra.mxu1 %v1025_v35  ;;  %589 = vmatmul.bf16.vlgmr.msrb.gmra.mxu3 %v1025_v35  ;;  %v102_v35 = vperm.slane %v98_v3, 2 }
  0x58   :  { %537 = vmatmul.bf16.gmra.mxu0 %v1034_v20 }
  0x59   :  { %575 = vmatmul.bf16.gmra.mxu2 %v1034_v20 }
  0x5a   :  { %556 = vmatmul.bf16.gmra.mxu1 %v1034_v20  ;;  %594 = vmatmul.bf16.gmra.mxu3 %v1034_v20 }
  0xa5   :  { %v457_v6 = vpop.f32.mrf.mxu0  ;;  %v476_v8 = vpop.f32.mrf.mxu1 }
  0xa6   :  { %v458_v7 = vadd.f32 %v457_v6, %v100_v4  ;;  %v477_v9 = vadd.f32 %v476_v8, %v101_v5 }
  0xa8   :  { %600 = vst [vmem:[%s1150_s3] sm:$0xff] %v458_v7 }
  0xa9   :  { %601 = vst [vmem:[%s1150_s3 + $0x8] sm:$0xff] %v477_v9 }
  0xac   :  { %v495_v11 = vpop.f32.mrf.mxu2 }
  0xad   :  { %v496_v12 = vadd.f32 %v495_v11, %v102_v35  ;;  %v514_v13 = vpop.f32.mrf.mxu3  ;;  %v459_v14 = vpop.f32.mrf.mxu0 }
  0xae   :  { %v515_v15 = vadd.f32 %v514_v13, %v103_v10  ;;  %v460_v16 = vadd.f32 %v459_v14, %v100_v4  ;;  %v478_v17 = vpop.f32.mrf.mxu1 }
  0xaf   :  { %602 = vst [vmem:[%s1150_s3 + $0x10] sm:$0xff] %v496_v12  ;;  %v479_v18 = vadd.f32 %v478_v17, %v101_v5 }
  0xb0   :  { %603 = vst [vmem:[%s1150_s3 + $0x18] sm:$0xff] %v515_v15 }
  0xb1   :  { %608 = vst [vmem:[%s1150_s3 + $0x40] sm:$0xff] %v460_v16 }
  0xb2   :  { %609 = vst [vmem:[%s1150_s3 + $0x48] sm:$0xff] %v479_v18 }
  0xb4   :  { %v497_v19 = vpop.f32.mrf.mxu2 }
  0xb5   :  { %v498_v20 = vadd.f32 %v497_v19, %v102_v35  ;;  %v516_v21 = vpop.f32.mrf.mxu3  ;;  %v462_v22 = vpop.f32.mrf.mxu0 }
  0xb6   :  { %v517_v23 = vadd.f32 %v516_v21, %v103_v10  ;;  %v463_v24 = vadd.f32 %v462_v22, %v100_v4  ;;  %v481_v25 = vpop.f32.mrf.mxu1 }
  0xb7   :  { %610 = vst [vmem:[%s1150_s3 + $0x50] sm:$0xff] %v498_v20  ;;  %v482_v26 = vadd.f32 %v481_v25, %v101_v5 }
  0xb8   :  { %611 = vst [vmem:[%s1150_s3 + $0x58] sm:$0xff] %v517_v23 }
  0xb9   :  { %616 = vst [vmem:[%s1150_s3 + $0x80] sm:$0xff] %v463_v24 }
  0xba   :  { %617 = vst [vmem:[%s1150_s3 + $0x88] sm:$0xff] %v482_v26 }
  0xbc   :  { %v500_v27 = vpop.f32.mrf.mxu2 }
  0xbd   :  { %v501_v28 = vadd.f32 %v500_v27, %v102_v35  ;;  %v519_v29 = vpop.f32.mrf.mxu3  ;;  %v464_v30 = vpop.f32.mrf.mxu0 }
  0xbe   :  { %v520_v31 = vadd.f32 %v519_v29, %v103_v10  ;;  %v465_v32 = vadd.f32 %v464_v30, %v100_v4  ;;  %v483_v33 = vpop.f32.mrf.mxu1 }
  0xbf   :  { %618 = vst [vmem:[%s1150_s3 + $0x90] sm:$0xff] %v501_v28  ;;  %v484_v34 = vadd.f32 %v483_v33, %v101_v5 }
  0xc0   :  { %619 = vst [vmem:[%s1150_s3 + $0x98] sm:$0xff] %v520_v31 }
  0xc1   :  { %624 = vst [vmem:[%s1150_s3 + $0xc0] sm:$0xff] %v465_v32 }
  0xc2   :  { %625 = vst [vmem:[%s1150_s3 + $0xc8] sm:$0xff] %v484_v34 }
  0xc4   :  { %v502_v37 = vpop.f32.mrf.mxu2 }
  0xc5   :  { %v503_v39 = vadd.f32 %v502_v37, %v102_v35  ;;  %v521_v40 = vpop.f32.mrf.mxu3  ;;  %v533_v42 = vpop.f32.mrf.mxu0 }
  0xc6   :  { %v522_v41 = vadd.f32 %v521_v40, %v103_v10  ;;  %v534_v43 = vadd.f32 %v533_v42, %v104_v36 }
  0xc7   :  { %626 = vst [vmem:[%s1150_s3 + $0xd0] sm:$0xff] %v503_v39  ;;  %v552_v44 = vpop.f32.mrf.mxu1 }
  0xc8   :  { %627 = vst [vmem:[%s1150_s3 + $0xd8] sm:$0xff] %v522_v41  ;;  %v553_v45 = vadd.f32 %v552_v44, %v105_v38 }
  0xc9   :  { %604 = vst [vmem:[%s1150_s3 + $0x20] sm:$0xff] %v534_v43 }
  0xca   :  { %605 = vst [vmem:[%s1150_s3 + $0x28] sm:$0xff] %v553_v45 }
  0xcc   :  { %v571_v48 = vpop.f32.mrf.mxu2 }
  0xcd   :  { %v572_v49 = vadd.f32 %v571_v48, %v106_v46  ;;  %v590_v50 = vpop.f32.mrf.mxu3  ;;  %v535_v52 = vpop.f32.mrf.mxu0 }
  0xce   :  { %v591_v51 = vadd.f32 %v590_v50, %v107_v47  ;;  %v536_v53 = vadd.f32 %v535_v52, %v104_v36 }
  0xcf   :  { %606 = vst [vmem:[%s1150_s3 + $0x30] sm:$0xff] %v572_v49  ;;  %v554_v54 = vpop.f32.mrf.mxu1 }
  0xd0   :  { %607 = vst [vmem:[%s1150_s3 + $0x38] sm:$0xff] %v591_v51  ;;  %v555_v55 = vadd.f32 %v554_v54, %v105_v38 }
  0xd1   :  { %612 = vst [vmem:[%s1150_s3 + $0x60] sm:$0xff] %v536_v53 }
  0xd2   :  { %613 = vst [vmem:[%s1150_s3 + $0x68] sm:$0xff] %v555_v55 }
  0xd4   :  { %v573_v56 = vpop.f32.mrf.mxu2 }
  0xd5   :  { %v574_v57 = vadd.f32 %v573_v56, %v106_v46  ;;  %v592_v58 = vpop.f32.mrf.mxu3  ;;  %v538_v60 = vpop.f32.mrf.mxu0 }
  0xd6   :  { %v593_v59 = vadd.f32 %v592_v58, %v107_v47  ;;  %v539_v61 = vadd.f32 %v538_v60, %v104_v36 }
  0xd7   :  { %614 = vst [vmem:[%s1150_s3 + $0x70] sm:$0xff] %v574_v57  ;;  %v557_v62 = vpop.f32.mrf.mxu1 }
  0xd8   :  { %615 = vst [vmem:[%s1150_s3 + $0x78] sm:$0xff] %v593_v59  ;;  %v558_v63 = vadd.f32 %v557_v62, %v105_v38 }
  0xd9   :  { %620 = vst [vmem:[%s1150_s3 + $0xa0] sm:$0xff] %v539_v61 }
  0xda   :  { %621 = vst [vmem:[%s1150_s3 + $0xa8] sm:$0xff] %v558_v63 }
  0xdc   :  { %v576_v0 = vpop.f32.mrf.mxu2 }
  0xdd   :  { %v577_v1 = vadd.f32 %v576_v0, %v106_v46  ;;  %v595_v2 = vpop.f32.mrf.mxu3  ;;  %v540_v4 = vpop.f32.mrf.mxu0 }
  0xde   :  { %v596_v3 = vadd.f32 %v595_v2, %v107_v47  ;;  %v541_v5 = vadd.f32 %v540_v4, %v104_v36 }
  0xdf   :  { %622 = vst [vmem:[%s1150_s3 + $0xb0] sm:$0xff] %v577_v1  ;;  %v559_v6 = vpop.f32.mrf.mxu1 }
  0xe0   :  { %623 = vst [vmem:[%s1150_s3 + $0xb8] sm:$0xff] %v596_v3  ;;  %v560_v7 = vadd.f32 %v559_v6, %v105_v38 }
  0xe1   :  { %628 = vst [vmem:[%s1150_s3 + $0xe0] sm:$0xff] %v541_v5 }
  0xe2   :  { %629 = vst [vmem:[%s1150_s3 + $0xe8] sm:$0xff] %v560_v7 }
  0xe4   :  { %v578_v8 = vpop.f32.mrf.mxu2 }
  0xe5   :  { %v579_v9 = vadd.f32 %v578_v8, %v106_v46  ;;  %v597_v35 = vpop.f32.mrf.mxu3 }
  0xe6   :  { %v598_v10 = vadd.f32 %v597_v35, %v107_v47 }
  0xe7   :  { %630 = vst [vmem:[%s1150_s3 + $0xf0] sm:$0xff] %v579_v9 }
  0xe8   :  { %631 = vst [vmem:[%s1150_s3 + $0xf8] sm:$0xff] %v598_v10 }
  0xe9   :  { %636 = vsyncpa [#allocation3], 1 }

</bundles_post_ra>
